<compile_context>
chip_gen: v6e
topology: v6e:2x2x1
jax: 0.10.0
libtpu: 0.0.40
codegen_flags: <defaults>
</compile_context>

<pallas_src>
import functools

import jax
import jax.numpy as jnp
from jax import lax
from jax.experimental import pallas as pl
from jax.experimental.pallas import tpu as pltpu


def _round_up(x, m):
    return ((x + m - 1) // m) * m


# ----------------------------------------------------------------------------
# Kernel 1: fused multi-layer LSTM, single invocation, fully VMEM resident.
#
# Inputs : x (T*B, D0) bf16 time-major flattened, then per layer
#          [W_ih (D_l,4H) bf16, W_hh (H,4H) bf16, b (1,4H) f32]
#          (gate column order [i, f, o, g]; bias = b_ih + b_hh; weights
#          stored transposed).
# Outputs: y (T*B, H) bf16 time-major, h_N (L, B, H) f32, c_N (L, B, H) f32.
# Scratch: xg (T*B, 4H) f32 hoisted gate pre-activations,
#          act (T*B, H) f32 inter-layer activations.
# ----------------------------------------------------------------------------
def _lstm_fused_kernel(*refs, num_layers, seq_len, batch, hidden):
    T, B, H = seq_len, batch, hidden
    x_ref = refs[0]
    w_refs = refs[1:1 + 3 * num_layers]
    y_ref, hN_ref, cN_ref = refs[1 + 3 * num_layers:4 + 3 * num_layers]
    xg_sc, act_sc = refs[4 + 3 * num_layers:]

    for l in range(num_layers):
        wih = w_refs[3 * l][...]            # (D_l, 4H) bf16
        whh = w_refs[3 * l + 1][...]        # (H,   4H) bf16
        bias = w_refs[3 * l + 2][...]       # (1,   4H) f32

        # -- Hoisted input projection: one flattened matmul over all T*B rows,
        #    bias added once (no per-batch loop, no stack relayout). ----------
        if l == 0:
            inp = x_ref[...]                                 # (T*B, D0) bf16
        else:
            inp = act_sc[...].astype(jnp.bfloat16)           # (T*B, H)  bf16
        xg_sc[...] = (jnp.dot(inp, wih, preferred_element_type=jnp.float32)
                      + bias)                                # (T*B, 4H) f32

        # -- Sequential recurrence over time; h/c live in the loop carry. ----
        def step(t, carry):
            h, c = carry                                     # (B, H) f32 each
            base = pl.multiple_of(t * B, B)
            g = xg_sc[pl.ds(base, B), :] + jnp.dot(
                h.astype(jnp.bfloat16), whh,
                preferred_element_type=jnp.float32)          # (B, 4H) f32
            # Gate order [i, f, o, g]: one sigmoid over the leading 3H lanes,
            # one tanh over the trailing H lanes (2 EUP ops per step).
            sg = jax.nn.sigmoid(g[:, :3 * H])
            gg = jnp.tanh(g[:, 3 * H:])
            i_g = sg[:, 0 * H:1 * H]
            f_g = sg[:, 1 * H:2 * H]
            o_g = sg[:, 2 * H:3 * H]
            c_new = f_g * c + i_g * gg
            h_new = o_g * jnp.tanh(c_new)
            act_sc[pl.ds(base, B), :] = h_new
            return (h_new, c_new)

        init = (jnp.zeros((B, H), jnp.float32),
                jnp.zeros((B, H), jnp.float32))
        h_fin, c_fin = lax.fori_loop(0, T, step, init, unroll=(T <= 32))

        # Final states written exactly once per layer (not every timestep).
        hN_ref[l] = h_fin
        cN_ref[l] = c_fin

    # Last layer's activations -> bf16 output (single bulk cast + store).
    y_ref[...] = act_sc[...].astype(jnp.bfloat16)


def lstm_fused(x_flat, w_ih, w_hh, b, *, batch, seq_len):
    """x_flat: (T*B, D0) bf16 time-major.  Returns y (T*B,H) bf16, h_N, c_N (L,B,H) f32."""
    T, B = seq_len, batch
    L = len(w_ih)
    H = w_hh[0].shape[0]
    flat_w = []
    for l in range(L):
        flat_w += [w_ih[l], w_hh[l], b[l]]

    # Generation-aware VMEM budget: everything (input, weights, outputs,
    # scratch) is resident at once in this gridless call.
    raw = x_flat.size * x_flat.dtype.itemsize
    for w in flat_w:
        raw += w.size * w.dtype.itemsize
    raw += T * B * H * 2                       # y (bf16)
    raw += 2 * L * B * H * 4                   # h_N, c_N (f32)
    raw += T * B * 4 * H * 4                   # xg scratch (f32)
    raw += T * B * H * 4                       # act scratch (f32)
    vmem_limit = min(128 << 20, max(32 << 20, int(raw * 1.5) + (4 << 20)))

    kernel = functools.partial(_lstm_fused_kernel, num_layers=L,
                               seq_len=T, batch=B, hidden=H)
    return pl.pallas_call(
        kernel,
        out_shape=(jax.ShapeDtypeStruct((T * B, H), jnp.bfloat16),
                   jax.ShapeDtypeStruct((L, B, H), jnp.float32),
                   jax.ShapeDtypeStruct((L, B, H), jnp.float32)),
        scratch_shapes=[
            pltpu.VMEM((T * B, 4 * H), jnp.float32),   # hoisted gate pre-acts
            pltpu.VMEM((T * B, H), jnp.float32),       # inter-layer activations
        ],
        compiler_params=pltpu.CompilerParams(vmem_limit_bytes=vmem_limit),
    )(x_flat, *flat_w)


# ----------------------------------------------------------------------------
# Kernel 2: tiled output projection + ReLU, lane-dense (V padded to 128).
#   (N, H) bf16 @ (H, Vp) bf16 + b, relu.  Grid = (vocab tiles, row tiles)
#   with row tiles innermost, so the big weight block is grid-resident and
#   streamed from HBM exactly once.
# ----------------------------------------------------------------------------
def _linear_relu_kernel(x_ref, w_ref, b_ref, o_ref):
    acc = jnp.dot(x_ref[...], w_ref[...], preferred_element_type=jnp.float32)
    o_ref[...] = jnp.maximum(acc + b_ref[...], 0.0)


def linear_relu(x2d, w_bf16, b_row):
    """x2d: (N, H) bf16, N % 128 == 0; w: (H, Vp) bf16, Vp % 128 == 0; b_row: (1, Vp) f32."""
    N, H = x2d.shape
    Vp = w_bf16.shape[1]
    tn = 256 if N % 256 == 0 else 128
    tv = next(t for t in (1024, 512, 256, 128) if Vp % t == 0)
    grid = (Vp // tv, N // tn)   # row tiles innermost -> weight block stays resident
    return pl.pallas_call(
        _linear_relu_kernel,
        out_shape=jax.ShapeDtypeStruct((N, Vp), jnp.float32),
        grid=grid,
        in_specs=[
            pl.BlockSpec((tn, H), lambda i, j: (j, 0)),
            pl.BlockSpec((H, tv), lambda i, j: (0, i)),
            pl.BlockSpec((1, tv), lambda i, j: (0, i)),
        ],
        out_specs=pl.BlockSpec((tn, tv), lambda i, j: (j, i)),
        compiler_params=pltpu.CompilerParams(
            dimension_semantics=("parallel", "parallel")),
    )(x2d, w_bf16, b_row)


# ----------------------------------------------------------------------------
# Full decoder forward (embedding gather / concat glue stays in plain JAX).
# ----------------------------------------------------------------------------
def decoder_word2vec_forward(caption, img_ctx, params):
    emb_table = params["embedding"]                         # (V, E) frozen f32
    B, T = caption.shape
    C = img_ctx.shape[-1]
    V = emb_table.shape[0]

    emb = jnp.take(emb_table, caption, axis=0)              # (B, T, E)
    ctx = jnp.broadcast_to(img_ctx[:, None, :], (B, T, C))  # torch.cat([...]*T)
    x = jnp.concatenate([emb, ctx], axis=-1)                # (B, T, E+C)

    # Time-major flattened (T*B, D) bf16 input so the in-kernel input
    # projection is one big matmul per layer.
    x_tm = jnp.transpose(x, (1, 0, 2)).reshape(T * B, -1).astype(jnp.bfloat16)

    y_flat, h_n, c_n = lstm_fused(x_tm, params["w_ih"], params["w_hh"],
                                  params["b"], batch=B, seq_len=T)

    H = params["w_hh"][0].shape[0]
    # Reorder the small bf16 activation to batch-first rows and pad rows to a
    # multiple of 128 so the projection uses >=128-row MXU tiles.
    y_bt = y_flat.reshape(T, B, H).transpose(1, 0, 2).reshape(B * T, H)
    N = B * T
    Np = _round_up(N, 128)
    if Np != N:
        y_bt = jnp.pad(y_bt, ((0, Np - N), (0, 0)))

    out_p = linear_relu(y_bt, params["w_out"], params["b_out"])  # (Np, Vp) f32
    out = out_p[:N].reshape(B, T, -1)[:, :, :V]                  # drop padding
    return out, (h_n, c_n)


# ----------------------------------------------------------------------------
# Pure-JAX reference (same weight layout / bf16 matmul operands / f32 accum).
# Gate column order is [i, f, o, g].
# ----------------------------------------------------------------------------
def _reference_forward(caption, img_ctx, params):
    emb_table = params["embedding"]
    B, T = caption.shape
    V = emb_table.shape[0]
    emb = jnp.take(emb_table, caption, axis=0)
    ctx = jnp.broadcast_to(img_ctx[:, None, :], (B, T, img_ctx.shape[-1]))
    x = jnp.concatenate([emb, ctx], axis=-1)                # (B, T, D)

    def layer(x_btd, w_ih, w_hh, b):
        Hh = w_hh.shape[0]
        Bb = x_btd.shape[0]

        def step(carry, x_t):
            h, c = carry
            gates = (jnp.dot(x_t.astype(jnp.bfloat16), w_ih,
                             preferred_element_type=jnp.float32)
                     + jnp.dot(h.astype(jnp.bfloat16), w_hh,
                               preferred_element_type=jnp.float32)
                     + b[0])
            i = jax.nn.sigmoid(gates[:, 0 * Hh:1 * Hh])
            f = jax.nn.sigmoid(gates[:, 1 * Hh:2 * Hh])
            o = jax.nn.sigmoid(gates[:, 2 * Hh:3 * Hh])
            g = jnp.tanh(gates[:, 3 * Hh:4 * Hh])
            c = f * c + i * g
            h = o * jnp.tanh(c)
            return (h, c), h

        init = (jnp.zeros((Bb, Hh), jnp.float32), jnp.zeros((Bb, Hh), jnp.float32))
        (h_n, c_n), ys = lax.scan(step, init, jnp.transpose(x_btd, (1, 0, 2)))
        return jnp.transpose(ys, (1, 0, 2)), h_n, c_n

    h_list, c_list = [], []
    for l in range(len(params["w_ih"])):
        x, h_n, c_n = layer(x, params["w_ih"][l], params["w_hh"][l], params["b"][l])
        h_list.append(h_n)
        c_list.append(c_n)

    Hh = x.shape[-1]
    out = jnp.maximum(
        jnp.dot(x.reshape(B * T, Hh).astype(jnp.bfloat16), params["w_out"],
                preferred_element_type=jnp.float32) + params["b_out"], 0.0)
    out = out.reshape(B, T, -1)[:, :, :V]
    return out, (jnp.stack(h_list), jnp.stack(c_list))


# ----------------------------------------------------------------------------
# Deterministic parameter construction + demo run.
# ----------------------------------------------------------------------------
def make_params(key, vocab_size, embedding_dim, context_dim, hidden_dim, num_layers):
    keys = jax.random.split(key, 3 + 4 * num_layers)
    params = {}
    params["embedding"] = jax.random.normal(
        keys[0], (vocab_size, embedding_dim), jnp.float32) * 0.1

    w_ih, w_hh, b = [], [], []
    for l in range(num_layers):
        in_dim = (embedding_dim + context_dim) if l == 0 else hidden_dim
        k0, k1, k2, k3 = keys[1 + 4 * l: 5 + 4 * l]
        # Stored transposed: (in_dim, 4H), (H, 4H); gate column order [i,f,o,g]
        # so sigmoid covers one contiguous 3H slice in the kernel.
        w_ih.append((jax.random.normal(k0, (in_dim, 4 * hidden_dim), jnp.float32)
                     * 0.1).astype(jnp.bfloat16))
        w_hh.append((jax.random.normal(k1, (hidden_dim, 4 * hidden_dim), jnp.float32)
                     * 0.1).astype(jnp.bfloat16))
        b_ih = jax.random.normal(k2, (4 * hidden_dim,), jnp.float32) * 0.1
        b_hh = jax.random.normal(k3, (4 * hidden_dim,), jnp.float32) * 0.1
        b.append((b_ih + b_hh).reshape(1, 4 * hidden_dim))
    params["w_ih"], params["w_hh"], params["b"] = w_ih, w_hh, b

    # Output projection padded to a lane-dense vocab (multiple of 128).
    vp = _round_up(vocab_size, 128)
    w_out = jax.random.normal(keys[-2], (hidden_dim, vocab_size), jnp.float32) * 0.1
    b_out = jax.random.normal(keys[-1], (vocab_size,), jnp.float32) * 0.1
    params["w_out"] = jnp.pad(w_out, ((0, 0), (0, vp - vocab_size))).astype(jnp.bfloat16)
    params["b_out"] = jnp.pad(b_out, (0, vp - vocab_size)).reshape(1, vp)
    return params


if __name__ == "__main__":
    # Small shapes consistent with the module's forward.
    B, T = 2, 8
    vocab_size = 64
    embedding_dim = 16
    context_dim = 8
    hidden_dim = 32
    num_layers = 2

    root = jax.random.PRNGKey(0)
    k_param, k_cap, k_ctx = jax.random.split(root, 3)

    params = make_params(k_param, vocab_size, embedding_dim,
                         context_dim, hidden_dim, num_layers)
    caption = jax.random.randint(k_cap, (B, T), 0, vocab_size, dtype=jnp.int32)
    img_ctx = jax.random.normal(k_ctx, (B, context_dim), jnp.float32)

    out, (h_n, c_n) = decoder_word2vec_forward(caption, img_ctx, params)
    out = jax.block_until_ready(out)
    h_n = jax.block_until_ready(h_n)
    c_n = jax.block_until_ready(c_n)

    # Sanity check vs. pure-JAX reference (tolerance loosened for bf16 matmuls).
    ref_out, (ref_h, ref_c) = _reference_forward(caption, img_ctx, params)
    assert out.shape == (B, T, vocab_size)
    assert h_n.shape == (num_layers, B, hidden_dim)
    assert c_n.shape == (num_layers, B, hidden_dim)
    assert jnp.allclose(out, ref_out, atol=1e-2, rtol=1e-2), "output mismatch"
    assert jnp.allclose(h_n, ref_h, atol=1e-2, rtol=1e-2), "h_n mismatch"
    assert jnp.allclose(c_n, ref_c, atol=1e-2, rtol=1e-2), "c_n mismatch"

    print("KERNEL_OK")
</pallas_src>

<mosaic_0001>
module attributes {stable_mosaic.version = 11 : i64} {
  func.func @_lstm_fused_kernel(%arg0: memref<16x24xbf16, #tpu.memory_space<vmem>>, %arg1: memref<24x128xbf16, #tpu.memory_space<vmem>>, %arg2: memref<32x128xbf16, #tpu.memory_space<vmem>>, %arg3: memref<1x128xf32, #tpu.memory_space<vmem>>, %arg4: memref<32x128xbf16, #tpu.memory_space<vmem>>, %arg5: memref<32x128xbf16, #tpu.memory_space<vmem>>, %arg6: memref<1x128xf32, #tpu.memory_space<vmem>>, %arg7: memref<16x32xbf16, #tpu.memory_space<vmem>>, %arg8: memref<2x2x32xf32, #tpu.memory_space<vmem>>, %arg9: memref<2x2x32xf32, #tpu.memory_space<vmem>>, %arg10: memref<16x128xf32, #tpu.memory_space<vmem>>, %arg11: memref<16x32xf32, #tpu.memory_space<vmem>>) attributes {dimension_semantics = [], scalar_prefetch = 0 : i64, scratch_operands = 2 : i64, tpu.core_type = #tpu.core_type<tc>} {
    %c0 = arith.constant 0 : index
    %c0_0 = arith.constant 0 : index
    %0 = vector.load %arg1[%c0, %c0_0] : memref<24x128xbf16, #tpu.memory_space<vmem>>, vector<24x128xbf16>
    %c0_1 = arith.constant 0 : index
    %c0_2 = arith.constant 0 : index
    %1 = vector.load %arg2[%c0_1, %c0_2] : memref<32x128xbf16, #tpu.memory_space<vmem>>, vector<32x128xbf16>
    %c0_3 = arith.constant 0 : index
    %c0_4 = arith.constant 0 : index
    %2 = vector.load %arg3[%c0_3, %c0_4] : memref<1x128xf32, #tpu.memory_space<vmem>>, vector<1x128xf32>
    %c0_5 = arith.constant 0 : index
    %c0_6 = arith.constant 0 : index
    %3 = vector.load %arg0[%c0_5, %c0_6] : memref<16x24xbf16, #tpu.memory_space<vmem>>, vector<16x24xbf16>
    %cst = arith.constant dense<0.000000e+00> : vector<16x128xf32>
    %4 = tpu.matmul %3, %0, %cst {dimension_numbers = #tpu.dot_dimension_numbers<[1], [0], [0], [1], [0, 0, 1, 1], [], []>} : vector<16x24xbf16>, vector<24x128xbf16>, vector<16x128xf32> -> vector<16x128xf32>
    %5 = vector.broadcast %2 : vector<1x128xf32> to vector<16x128xf32>
    %6 = arith.addf %4, %5 : vector<16x128xf32>
    %c0_7 = arith.constant 0 : index
    %c0_8 = arith.constant 0 : index
    %7 = vector.load %arg10[%c0_7, %c0_8] : memref<16x128xf32, #tpu.memory_space<vmem>>, vector<16x128xf32>
    tpu.vector_store %arg10[%c0_7, %c0_8], %6 {strides = array<i32>} : memref<16x128xf32, #tpu.memory_space<vmem>>, vector<16x128xf32>,
    %cst_9 = arith.constant 0.000000e+00 : f32
    %8 = vector.broadcast %cst_9 : f32 to vector<2x32xf32>
    %cst_10 = arith.constant 0.000000e+00 : f32
    %9 = vector.broadcast %cst_10 : f32 to vector<2x32xf32>
    %c0_i32 = arith.constant 0 : i32
    %c2_i32 = arith.constant 2 : i32
    %10 = arith.muli %c0_i32, %c2_i32 : i32
    %11 = tpu.assume_multiple %10, 2 : i32
    %12 = arith.index_cast %11 : i32 to index
    %c0_11 = arith.constant 0 : index
    %13 = vector.load %arg10[%12, %c0_11] : memref<16x128xf32, #tpu.memory_space<vmem>>, vector<2x128xf32>
    %14 = arith.truncf %8 : vector<2x32xf32> to vector<2x32xbf16>
    %cst_12 = arith.constant dense<0.000000e+00> : vector<2x128xf32>
    %15 = tpu.matmul %14, %1, %cst_12 {dimension_numbers = #tpu.dot_dimension_numbers<[1], [0], [0], [1], [0, 0, 1, 1], [], []>} : vector<2x32xbf16>, vector<32x128xbf16>, vector<2x128xf32> -> vector<2x128xf32>
    %16 = arith.addf %13, %15 : vector<2x128xf32>
    %17 = vector.extract_strided_slice %16 {offsets = [0, 0], sizes = [2, 96], strides = [1, 1]} : vector<2x128xf32> to vector<2x96xf32>
    %18 = arith.negf %17 : vector<2x96xf32>
    %19 = math.exp %18 : vector<2x96xf32>
    %cst_13 = arith.constant 1.000000e+00 : f32
    %20 = vector.broadcast %cst_13 : f32 to vector<2x96xf32>
    %21 = arith.addf %20, %19 : vector<2x96xf32>
    %22 = arith.divf %20, %21 : vector<2x96xf32>
    %23 = vector.extract_strided_slice %16 {offsets = [0, 96], sizes = [2, 32], strides = [1, 1]} : vector<2x128xf32> to vector<2x32xf32>
    %24 = math.tanh %23 : vector<2x32xf32>
    %25 = vector.extract_strided_slice %22 {offsets = [0, 0], sizes = [2, 32], strides = [1, 1]} : vector<2x96xf32> to vector<2x32xf32>
    %26 = vector.extract_strided_slice %22 {offsets = [0, 32], sizes = [2, 32], strides = [1, 1]} : vector<2x96xf32> to vector<2x32xf32>
    %27 = vector.extract_strided_slice %22 {offsets = [0, 64], sizes = [2, 32], strides = [1, 1]} : vector<2x96xf32> to vector<2x32xf32>
    %28 = arith.mulf %26, %9 : vector<2x32xf32>
    %29 = arith.mulf %25, %24 : vector<2x32xf32>
    %30 = arith.addf %28, %29 : vector<2x32xf32>
    %31 = math.tanh %30 : vector<2x32xf32>
    %32 = arith.mulf %27, %31 : vector<2x32xf32>
    %33 = arith.index_cast %11 : i32 to index
    %c0_14 = arith.constant 0 : index
    %34 = vector.load %arg11[%33, %c0_14] : memref<16x32xf32, #tpu.memory_space<vmem>>, vector<2x32xf32>
    tpu.vector_store %arg11[%33, %c0_14], %32 {strides = array<i32>} : memref<16x32xf32, #tpu.memory_space<vmem>>, vector<2x32xf32>,
    %c1_i32 = arith.constant 1 : i32
    %c2_i32_15 = arith.constant 2 : i32
    %35 = arith.muli %c1_i32, %c2_i32_15 : i32
    %36 = tpu.assume_multiple %35, 2 : i32
    %37 = arith.index_cast %36 : i32 to index
    %c0_16 = arith.constant 0 : index
    %38 = vector.load %arg10[%37, %c0_16] : memref<16x128xf32, #tpu.memory_space<vmem>>, vector<2x128xf32>
    %39 = arith.truncf %32 : vector<2x32xf32> to vector<2x32xbf16>
    %cst_17 = arith.constant dense<0.000000e+00> : vector<2x128xf32>
    %40 = tpu.matmul %39, %1, %cst_17 {dimension_numbers = #tpu.dot_dimension_numbers<[1], [0], [0], [1], [0, 0, 1, 1], [], []>} : vector<2x32xbf16>, vector<32x128xbf16>, vector<2x128xf32> -> vector<2x128xf32>
    %41 = arith.addf %38, %40 : vector<2x128xf32>
    %42 = vector.extract_strided_slice %41 {offsets = [0, 0], sizes = [2, 96], strides = [1, 1]} : vector<2x128xf32> to vector<2x96xf32>
    %43 = arith.negf %42 : vector<2x96xf32>
    %44 = math.exp %43 : vector<2x96xf32>
    %cst_18 = arith.constant 1.000000e+00 : f32
    %45 = vector.broadcast %cst_18 : f32 to vector<2x96xf32>
    %46 = arith.addf %45, %44 : vector<2x96xf32>
    %47 = arith.divf %45, %46 : vector<2x96xf32>
    %48 = vector.extract_strided_slice %41 {offsets = [0, 96], sizes = [2, 32], strides = [1, 1]} : vector<2x128xf32> to vector<2x32xf32>
    %49 = math.tanh %48 : vector<2x32xf32>
    %50 = vector.extract_strided_slice %47 {offsets = [0, 0], sizes = [2, 32], strides = [1, 1]} : vector<2x96xf32> to vector<2x32xf32>
    %51 = vector.extract_strided_slice %47 {offsets = [0, 32], sizes = [2, 32], strides = [1, 1]} : vector<2x96xf32> to vector<2x32xf32>
    %52 = vector.extract_strided_slice %47 {offsets = [0, 64], sizes = [2, 32], strides = [1, 1]} : vector<2x96xf32> to vector<2x32xf32>
    %53 = arith.mulf %51, %30 : vector<2x32xf32>
    %54 = arith.mulf %50, %49 : vector<2x32xf32>
    %55 = arith.addf %53, %54 : vector<2x32xf32>
    %56 = math.tanh %55 : vector<2x32xf32>
    %57 = arith.mulf %52, %56 : vector<2x32xf32>
    %58 = arith.index_cast %36 : i32 to index
    %c0_19 = arith.constant 0 : index
    %59 = vector.load %arg11[%58, %c0_19] : memref<16x32xf32, #tpu.memory_space<vmem>>, vector<2x32xf32>
    tpu.vector_store %arg11[%58, %c0_19], %57 {strides = array<i32>} : memref<16x32xf32, #tpu.memory_space<vmem>>, vector<2x32xf32>,
    %c2_i32_20 = arith.constant 2 : i32
    %c2_i32_21 = arith.constant 2 : i32
    %60 = arith.muli %c2_i32_20, %c2_i32_21 : i32
    %61 = tpu.assume_multiple %60, 2 : i32
    %62 = arith.index_cast %61 : i32 to index
    %c0_22 = arith.constant 0 : index
    %63 = vector.load %arg10[%62, %c0_22] : memref<16x128xf32, #tpu.memory_space<vmem>>, vector<2x128xf32>
    %64 = arith.truncf %57 : vector<2x32xf32> to vector<2x32xbf16>
    %cst_23 = arith.constant dense<0.000000e+00> : vector<2x128xf32>
    %65 = tpu.matmul %64, %1, %cst_23 {dimension_numbers = #tpu.dot_dimension_numbers<[1], [0], [0], [1], [0, 0, 1, 1], [], []>} : vector<2x32xbf16>, vector<32x128xbf16>, vector<2x128xf32> -> vector<2x128xf32>
    %66 = arith.addf %63, %65 : vector<2x128xf32>
    %67 = vector.extract_strided_slice %66 {offsets = [0, 0], sizes = [2, 96], strides = [1, 1]} : vector<2x128xf32> to vector<2x96xf32>
    %68 = arith.negf %67 : vector<2x96xf32>
    %69 = math.exp %68 : vector<2x96xf32>
    %cst_24 = arith.constant 1.000000e+00 : f32
    %70 = vector.broadcast %cst_24 : f32 to vector<2x96xf32>
    %71 = arith.addf %70, %69 : vector<2x96xf32>
    %72 = arith.divf %70, %71 : vector<2x96xf32>
    %73 = vector.extract_strided_slice %66 {offsets = [0, 96], sizes = [2, 32], strides = [1, 1]} : vector<2x128xf32> to vector<2x32xf32>
    %74 = math.tanh %73 : vector<2x32xf32>
    %75 = vector.extract_strided_slice %72 {offsets = [0, 0], sizes = [2, 32], strides = [1, 1]} : vector<2x96xf32> to vector<2x32xf32>
    %76 = vector.extract_strided_slice %72 {offsets = [0, 32], sizes = [2, 32], strides = [1, 1]} : vector<2x96xf32> to vector<2x32xf32>
    %77 = vector.extract_strided_slice %72 {offsets = [0, 64], sizes = [2, 32], strides = [1, 1]} : vector<2x96xf32> to vector<2x32xf32>
    %78 = arith.mulf %76, %55 : vector<2x32xf32>
    %79 = arith.mulf %75, %74 : vector<2x32xf32>
    %80 = arith.addf %78, %79 : vector<2x32xf32>
    %81 = math.tanh %80 : vector<2x32xf32>
    %82 = arith.mulf %77, %81 : vector<2x32xf32>
    %83 = arith.index_cast %61 : i32 to index
    %c0_25 = arith.constant 0 : index
    %84 = vector.load %arg11[%83, %c0_25] : memref<16x32xf32, #tpu.memory_space<vmem>>, vector<2x32xf32>
    tpu.vector_store %arg11[%83, %c0_25], %82 {strides = array<i32>} : memref<16x32xf32, #tpu.memory_space<vmem>>, vector<2x32xf32>,
    %c3_i32 = arith.constant 3 : i32
    %c2_i32_26 = arith.constant 2 : i32
    %85 = arith.muli %c3_i32, %c2_i32_26 : i32
    %86 = tpu.assume_multiple %85, 2 : i32
    %87 = arith.index_cast %86 : i32 to index
    %c0_27 = arith.constant 0 : index
    %88 = vector.load %arg10[%87, %c0_27] : memref<16x128xf32, #tpu.memory_space<vmem>>, vector<2x128xf32>
    %89 = arith.truncf %82 : vector<2x32xf32> to vector<2x32xbf16>
    %cst_28 = arith.constant dense<0.000000e+00> : vector<2x128xf32>
    %90 = tpu.matmul %89, %1, %cst_28 {dimension_numbers = #tpu.dot_dimension_numbers<[1], [0], [0], [1], [0, 0, 1, 1], [], []>} : vector<2x32xbf16>, vector<32x128xbf16>, vector<2x128xf32> -> vector<2x128xf32>
    %91 = arith.addf %88, %90 : vector<2x128xf32>
    %92 = vector.extract_strided_slice %91 {offsets = [0, 0], sizes = [2, 96], strides = [1, 1]} : vector<2x128xf32> to vector<2x96xf32>
    %93 = arith.negf %92 : vector<2x96xf32>
    %94 = math.exp %93 : vector<2x96xf32>
    %cst_29 = arith.constant 1.000000e+00 : f32
    %95 = vector.broadcast %cst_29 : f32 to vector<2x96xf32>
    %96 = arith.addf %95, %94 : vector<2x96xf32>
    %97 = arith.divf %95, %96 : vector<2x96xf32>
    %98 = vector.extract_strided_slice %91 {offsets = [0, 96], sizes = [2, 32], strides = [1, 1]} : vector<2x128xf32> to vector<2x32xf32>
    %99 = math.tanh %98 : vector<2x32xf32>
    %100 = vector.extract_strided_slice %97 {offsets = [0, 0], sizes = [2, 32], strides = [1, 1]} : vector<2x96xf32> to vector<2x32xf32>
    %101 = vector.extract_strided_slice %97 {offsets = [0, 32], sizes = [2, 32], strides = [1, 1]} : vector<2x96xf32> to vector<2x32xf32>
    %102 = vector.extract_strided_slice %97 {offsets = [0, 64], sizes = [2, 32], strides = [1, 1]} : vector<2x96xf32> to vector<2x32xf32>
    %103 = arith.mulf %101, %80 : vector<2x32xf32>
    %104 = arith.mulf %100, %99 : vector<2x32xf32>
    %105 = arith.addf %103, %104 : vector<2x32xf32>
    %106 = math.tanh %105 : vector<2x32xf32>
    %107 = arith.mulf %102, %106 : vector<2x32xf32>
    %108 = arith.index_cast %86 : i32 to index
    %c0_30 = arith.constant 0 : index
    %109 = vector.load %arg11[%108, %c0_30] : memref<16x32xf32, #tpu.memory_space<vmem>>, vector<2x32xf32>
    tpu.vector_store %arg11[%108, %c0_30], %107 {strides = array<i32>} : memref<16x32xf32, #tpu.memory_space<vmem>>, vector<2x32xf32>,
    %c4_i32 = arith.constant 4 : i32
    %c2_i32_31 = arith.constant 2 : i32
    %110 = arith.muli %c4_i32, %c2_i32_31 : i32
    %111 = tpu.assume_multiple %110, 2 : i32
    %112 = arith.index_cast %111 : i32 to index
    %c0_32 = arith.constant 0 : index
    %113 = vector.load %arg10[%112, %c0_32] : memref<16x128xf32, #tpu.memory_space<vmem>>, vector<2x128xf32>
    %114 = arith.truncf %107 : vector<2x32xf32> to vector<2x32xbf16>
    %cst_33 = arith.constant dense<0.000000e+00> : vector<2x128xf32>
    %115 = tpu.matmul %114, %1, %cst_33 {dimension_numbers = #tpu.dot_dimension_numbers<[1], [0], [0], [1], [0, 0, 1, 1], [], []>} : vector<2x32xbf16>, vector<32x128xbf16>, vector<2x128xf32> -> vector<2x128xf32>
    %116 = arith.addf %113, %115 : vector<2x128xf32>
    %117 = vector.extract_strided_slice %116 {offsets = [0, 0], sizes = [2, 96], strides = [1, 1]} : vector<2x128xf32> to vector<2x96xf32>
    %118 = arith.negf %117 : vector<2x96xf32>
    %119 = math.exp %118 : vector<2x96xf32>
    %cst_34 = arith.constant 1.000000e+00 : f32
    %120 = vector.broadcast %cst_34 : f32 to vector<2x96xf32>
    %121 = arith.addf %120, %119 : vector<2x96xf32>
    %122 = arith.divf %120, %121 : vector<2x96xf32>
    %123 = vector.extract_strided_slice %116 {offsets = [0, 96], sizes = [2, 32], strides = [1, 1]} : vector<2x128xf32> to vector<2x32xf32>
    %124 = math.tanh %123 : vector<2x32xf32>
    %125 = vector.extract_strided_slice %122 {offsets = [0, 0], sizes = [2, 32], strides = [1, 1]} : vector<2x96xf32> to vector<2x32xf32>
    %126 = vector.extract_strided_slice %122 {offsets = [0, 32], sizes = [2, 32], strides = [1, 1]} : vector<2x96xf32> to vector<2x32xf32>
    %127 = vector.extract_strided_slice %122 {offsets = [0, 64], sizes = [2, 32], strides = [1, 1]} : vector<2x96xf32> to vector<2x32xf32>
    %128 = arith.mulf %126, %105 : vector<2x32xf32>
    %129 = arith.mulf %125, %124 : vector<2x32xf32>
    %130 = arith.addf %128, %129 : vector<2x32xf32>
    %131 = math.tanh %130 : vector<2x32xf32>
    %132 = arith.mulf %127, %131 : vector<2x32xf32>
    %133 = arith.index_cast %111 : i32 to index
    %c0_35 = arith.constant 0 : index
    %134 = vector.load %arg11[%133, %c0_35] : memref<16x32xf32, #tpu.memory_space<vmem>>, vector<2x32xf32>
    tpu.vector_store %arg11[%133, %c0_35], %132 {strides = array<i32>} : memref<16x32xf32, #tpu.memory_space<vmem>>, vector<2x32xf32>,
    %c5_i32 = arith.constant 5 : i32
    %c2_i32_36 = arith.constant 2 : i32
    %135 = arith.muli %c5_i32, %c2_i32_36 : i32
    %136 = tpu.assume_multiple %135, 2 : i32
    %137 = arith.index_cast %136 : i32 to index
    %c0_37 = arith.constant 0 : index
    %138 = vector.load %arg10[%137, %c0_37] : memref<16x128xf32, #tpu.memory_space<vmem>>, vector<2x128xf32>
    %139 = arith.truncf %132 : vector<2x32xf32> to vector<2x32xbf16>
    %cst_38 = arith.constant dense<0.000000e+00> : vector<2x128xf32>
    %140 = tpu.matmul %139, %1, %cst_38 {dimension_numbers = #tpu.dot_dimension_numbers<[1], [0], [0], [1], [0, 0, 1, 1], [], []>} : vector<2x32xbf16>, vector<32x128xbf16>, vector<2x128xf32> -> vector<2x128xf32>
    %141 = arith.addf %138, %140 : vector<2x128xf32>
    %142 = vector.extract_strided_slice %141 {offsets = [0, 0], sizes = [2, 96], strides = [1, 1]} : vector<2x128xf32> to vector<2x96xf32>
    %143 = arith.negf %142 : vector<2x96xf32>
    %144 = math.exp %143 : vector<2x96xf32>
    %cst_39 = arith.constant 1.000000e+00 : f32
    %145 = vector.broadcast %cst_39 : f32 to vector<2x96xf32>
    %146 = arith.addf %145, %144 : vector<2x96xf32>
    %147 = arith.divf %145, %146 : vector<2x96xf32>
    %148 = vector.extract_strided_slice %141 {offsets = [0, 96], sizes = [2, 32], strides = [1, 1]} : vector<2x128xf32> to vector<2x32xf32>
    %149 = math.tanh %148 : vector<2x32xf32>
    %150 = vector.extract_strided_slice %147 {offsets = [0, 0], sizes = [2, 32], strides = [1, 1]} : vector<2x96xf32> to vector<2x32xf32>
    %151 = vector.extract_strided_slice %147 {offsets = [0, 32], sizes = [2, 32], strides = [1, 1]} : vector<2x96xf32> to vector<2x32xf32>
    %152 = vector.extract_strided_slice %147 {offsets = [0, 64], sizes = [2, 32], strides = [1, 1]} : vector<2x96xf32> to vector<2x32xf32>
    %153 = arith.mulf %151, %130 : vector<2x32xf32>
    %154 = arith.mulf %150, %149 : vector<2x32xf32>
    %155 = arith.addf %153, %154 : vector<2x32xf32>
    %156 = math.tanh %155 : vector<2x32xf32>
    %157 = arith.mulf %152, %156 : vector<2x32xf32>
    %158 = arith.index_cast %136 : i32 to index
    %c0_40 = arith.constant 0 : index
    %159 = vector.load %arg11[%158, %c0_40] : memref<16x32xf32, #tpu.memory_space<vmem>>, vector<2x32xf32>
    tpu.vector_store %arg11[%158, %c0_40], %157 {strides = array<i32>} : memref<16x32xf32, #tpu.memory_space<vmem>>, vector<2x32xf32>,
    %c6_i32 = arith.constant 6 : i32
    %c2_i32_41 = arith.constant 2 : i32
    %160 = arith.muli %c6_i32, %c2_i32_41 : i32
    %161 = tpu.assume_multiple %160, 2 : i32
    %162 = arith.index_cast %161 : i32 to index
    %c0_42 = arith.constant 0 : index
    %163 = vector.load %arg10[%162, %c0_42] : memref<16x128xf32, #tpu.memory_space<vmem>>, vector<2x128xf32>
    %164 = arith.truncf %157 : vector<2x32xf32> to vector<2x32xbf16>
    %cst_43 = arith.constant dense<0.000000e+00> : vector<2x128xf32>
    %165 = tpu.matmul %164, %1, %cst_43 {dimension_numbers = #tpu.dot_dimension_numbers<[1], [0], [0], [1], [0, 0, 1, 1], [], []>} : vector<2x32xbf16>, vector<32x128xbf16>, vector<2x128xf32> -> vector<2x128xf32>
    %166 = arith.addf %163, %165 : vector<2x128xf32>
    %167 = vector.extract_strided_slice %166 {offsets = [0, 0], sizes = [2, 96], strides = [1, 1]} : vector<2x128xf32> to vector<2x96xf32>
    %168 = arith.negf %167 : vector<2x96xf32>
    %169 = math.exp %168 : vector<2x96xf32>
    %cst_44 = arith.constant 1.000000e+00 : f32
    %170 = vector.broadcast %cst_44 : f32 to vector<2x96xf32>
    %171 = arith.addf %170, %169 : vector<2x96xf32>
    %172 = arith.divf %170, %171 : vector<2x96xf32>
    %173 = vector.extract_strided_slice %166 {offsets = [0, 96], sizes = [2, 32], strides = [1, 1]} : vector<2x128xf32> to vector<2x32xf32>
    %174 = math.tanh %173 : vector<2x32xf32>
    %175 = vector.extract_strided_slice %172 {offsets = [0, 0], sizes = [2, 32], strides = [1, 1]} : vector<2x96xf32> to vector<2x32xf32>
    %176 = vector.extract_strided_slice %172 {offsets = [0, 32], sizes = [2, 32], strides = [1, 1]} : vector<2x96xf32> to vector<2x32xf32>
    %177 = vector.extract_strided_slice %172 {offsets = [0, 64], sizes = [2, 32], strides = [1, 1]} : vector<2x96xf32> to vector<2x32xf32>
    %178 = arith.mulf %176, %155 : vector<2x32xf32>
    %179 = arith.mulf %175, %174 : vector<2x32xf32>
    %180 = arith.addf %178, %179 : vector<2x32xf32>
    %181 = math.tanh %180 : vector<2x32xf32>
    %182 = arith.mulf %177, %181 : vector<2x32xf32>
    %183 = arith.index_cast %161 : i32 to index
    %c0_45 = arith.constant 0 : index
    %184 = vector.load %arg11[%183, %c0_45] : memref<16x32xf32, #tpu.memory_space<vmem>>, vector<2x32xf32>
    tpu.vector_store %arg11[%183, %c0_45], %182 {strides = array<i32>} : memref<16x32xf32, #tpu.memory_space<vmem>>, vector<2x32xf32>,
    %c7_i32 = arith.constant 7 : i32
    %c2_i32_46 = arith.constant 2 : i32
    %185 = arith.muli %c7_i32, %c2_i32_46 : i32
    %186 = tpu.assume_multiple %185, 2 : i32
    %187 = arith.index_cast %186 : i32 to index
    %c0_47 = arith.constant 0 : index
    %188 = vector.load %arg10[%187, %c0_47] : memref<16x128xf32, #tpu.memory_space<vmem>>, vector<2x128xf32>
    %189 = arith.truncf %182 : vector<2x32xf32> to vector<2x32xbf16>
    %cst_48 = arith.constant dense<0.000000e+00> : vector<2x128xf32>
    %190 = tpu.matmul %189, %1, %cst_48 {dimension_numbers = #tpu.dot_dimension_numbers<[1], [0], [0], [1], [0, 0, 1, 1], [], []>} : vector<2x32xbf16>, vector<32x128xbf16>, vector<2x128xf32> -> vector<2x128xf32>
    %191 = arith.addf %188, %190 : vector<2x128xf32>
    %192 = vector.extract_strided_slice %191 {offsets = [0, 0], sizes = [2, 96], strides = [1, 1]} : vector<2x128xf32> to vector<2x96xf32>
    %193 = arith.negf %192 : vector<2x96xf32>
    %194 = math.exp %193 : vector<2x96xf32>
    %cst_49 = arith.constant 1.000000e+00 : f32
    %195 = vector.broadcast %cst_49 : f32 to vector<2x96xf32>
    %196 = arith.addf %195, %194 : vector<2x96xf32>
    %197 = arith.divf %195, %196 : vector<2x96xf32>
    %198 = vector.extract_strided_slice %191 {offsets = [0, 96], sizes = [2, 32], strides = [1, 1]} : vector<2x128xf32> to vector<2x32xf32>
    %199 = math.tanh %198 : vector<2x32xf32>
    %200 = vector.extract_strided_slice %197 {offsets = [0, 0], sizes = [2, 32], strides = [1, 1]} : vector<2x96xf32> to vector<2x32xf32>
    %201 = vector.extract_strided_slice %197 {offsets = [0, 32], sizes = [2, 32], strides = [1, 1]} : vector<2x96xf32> to vector<2x32xf32>
    %202 = vector.extract_strided_slice %197 {offsets = [0, 64], sizes = [2, 32], strides = [1, 1]} : vector<2x96xf32> to vector<2x32xf32>
    %203 = arith.mulf %201, %180 : vector<2x32xf32>
    %204 = arith.mulf %200, %199 : vector<2x32xf32>
    %205 = arith.addf %203, %204 : vector<2x32xf32>
    %206 = math.tanh %205 : vector<2x32xf32>
    %207 = arith.mulf %202, %206 : vector<2x32xf32>
    %208 = arith.index_cast %186 : i32 to index
    %c0_50 = arith.constant 0 : index
    %209 = vector.load %arg11[%208, %c0_50] : memref<16x32xf32, #tpu.memory_space<vmem>>, vector<2x32xf32>
    tpu.vector_store %arg11[%208, %c0_50], %207 {strides = array<i32>} : memref<16x32xf32, #tpu.memory_space<vmem>>, vector<2x32xf32>,
    %c8_i32 = arith.constant 8 : i32
    %c0_51 = arith.constant 0 : index
    %c0_52 = arith.constant 0 : index
    %c0_53 = arith.constant 0 : index
    %210 = vector.load %arg8[%c0_51, %c0_52, %c0_53] : memref<2x2x32xf32, #tpu.memory_space<vmem>>, vector<1x2x32xf32>
    %211 = vector.shape_cast %210 : vector<1x2x32xf32> to vector<2x32xf32>
    %212 = vector.shape_cast %207 : vector<2x32xf32> to vector<1x2x32xf32>
    tpu.vector_store %arg8[%c0_51, %c0_52, %c0_53], %212 {strides = array<i32>} : memref<2x2x32xf32, #tpu.memory_space<vmem>>, vector<1x2x32xf32>,
    %c0_54 = arith.constant 0 : index
    %c0_55 = arith.constant 0 : index
    %c0_56 = arith.constant 0 : index
    %213 = vector.load %arg9[%c0_54, %c0_55, %c0_56] : memref<2x2x32xf32, #tpu.memory_space<vmem>>, vector<1x2x32xf32>
    %214 = vector.shape_cast %213 : vector<1x2x32xf32> to vector<2x32xf32>
    %215 = vector.shape_cast %205 : vector<2x32xf32> to vector<1x2x32xf32>
    tpu.vector_store %arg9[%c0_54, %c0_55, %c0_56], %215 {strides = array<i32>} : memref<2x2x32xf32, #tpu.memory_space<vmem>>, vector<1x2x32xf32>,
    %c0_57 = arith.constant 0 : index
    %c0_58 = arith.constant 0 : index
    %216 = vector.load %arg4[%c0_57, %c0_58] : memref<32x128xbf16, #tpu.memory_space<vmem>>, vector<32x128xbf16>
    %c0_59 = arith.constant 0 : index
    %c0_60 = arith.constant 0 : index
    %217 = vector.load %arg5[%c0_59, %c0_60] : memref<32x128xbf16, #tpu.memory_space<vmem>>, vector<32x128xbf16>
    %c0_61 = arith.constant 0 : index
    %c0_62 = arith.constant 0 : index
    %218 = vector.load %arg6[%c0_61, %c0_62] : memref<1x128xf32, #tpu.memory_space<vmem>>, vector<1x128xf32>
    %c0_63 = arith.constant 0 : index
    %c0_64 = arith.constant 0 : index
    %219 = vector.load %arg11[%c0_63, %c0_64] : memref<16x32xf32, #tpu.memory_space<vmem>>, vector<16x32xf32>
    %220 = arith.truncf %219 : vector<16x32xf32> to vector<16x32xbf16>
    %cst_65 = arith.constant dense<0.000000e+00> : vector<16x128xf32>
    %221 = tpu.matmul %220, %216, %cst_65 {dimension_numbers = #tpu.dot_dimension_numbers<[1], [0], [0], [1], [0, 0, 1, 1], [], []>} : vector<16x32xbf16>, vector<32x128xbf16>, vector<16x128xf32> -> vector<16x128xf32>
    %222 = vector.broadcast %218 : vector<1x128xf32> to vector<16x128xf32>
    %223 = arith.addf %221, %222 : vector<16x128xf32>
    %c0_66 = arith.constant 0 : index
    %c0_67 = arith.constant 0 : index
    %224 = vector.load %arg10[%c0_66, %c0_67] : memref<16x128xf32, #tpu.memory_space<vmem>>, vector<16x128xf32>
    tpu.vector_store %arg10[%c0_66, %c0_67], %223 {strides = array<i32>} : memref<16x128xf32, #tpu.memory_space<vmem>>, vector<16x128xf32>,
    %cst_68 = arith.constant 0.000000e+00 : f32
    %225 = vector.broadcast %cst_68 : f32 to vector<2x32xf32>
    %cst_69 = arith.constant 0.000000e+00 : f32
    %226 = vector.broadcast %cst_69 : f32 to vector<2x32xf32>
    %c0_i32_70 = arith.constant 0 : i32
    %c2_i32_71 = arith.constant 2 : i32
    %227 = arith.muli %c0_i32_70, %c2_i32_71 : i32
    %228 = tpu.assume_multiple %227, 2 : i32
    %229 = arith.index_cast %228 : i32 to index
    %c0_72 = arith.constant 0 : index
    %230 = vector.load %arg10[%229, %c0_72] : memref<16x128xf32, #tpu.memory_space<vmem>>, vector<2x128xf32>
    %231 = arith.truncf %225 : vector<2x32xf32> to vector<2x32xbf16>
    %cst_73 = arith.constant dense<0.000000e+00> : vector<2x128xf32>
    %232 = tpu.matmul %231, %217, %cst_73 {dimension_numbers = #tpu.dot_dimension_numbers<[1], [0], [0], [1], [0, 0, 1, 1], [], []>} : vector<2x32xbf16>, vector<32x128xbf16>, vector<2x128xf32> -> vector<2x128xf32>
    %233 = arith.addf %230, %232 : vector<2x128xf32>
    %234 = vector.extract_strided_slice %233 {offsets = [0, 0], sizes = [2, 96], strides = [1, 1]} : vector<2x128xf32> to vector<2x96xf32>
    %235 = arith.negf %234 : vector<2x96xf32>
    %236 = math.exp %235 : vector<2x96xf32>
    %cst_74 = arith.constant 1.000000e+00 : f32
    %237 = vector.broadcast %cst_74 : f32 to vector<2x96xf32>
    %238 = arith.addf %237, %236 : vector<2x96xf32>
    %239 = arith.divf %237, %238 : vector<2x96xf32>
    %240 = vector.extract_strided_slice %233 {offsets = [0, 96], sizes = [2, 32], strides = [1, 1]} : vector<2x128xf32> to vector<2x32xf32>
    %241 = math.tanh %240 : vector<2x32xf32>
    %242 = vector.extract_strided_slice %239 {offsets = [0, 0], sizes = [2, 32], strides = [1, 1]} : vector<2x96xf32> to vector<2x32xf32>
    %243 = vector.extract_strided_slice %239 {offsets = [0, 32], sizes = [2, 32], strides = [1, 1]} : vector<2x96xf32> to vector<2x32xf32>
    %244 = vector.extract_strided_slice %239 {offsets = [0, 64], sizes = [2, 32], strides = [1, 1]} : vector<2x96xf32> to vector<2x32xf32>
    %245 = arith.mulf %243, %226 : vector<2x32xf32>
    %246 = arith.mulf %242, %241 : vector<2x32xf32>
    %247 = arith.addf %245, %246 : vector<2x32xf32>
    %248 = math.tanh %247 : vector<2x32xf32>
    %249 = arith.mulf %244, %248 : vector<2x32xf32>
    %250 = arith.index_cast %228 : i32 to index
    %c0_75 = arith.constant 0 : index
    %251 = vector.load %arg11[%250, %c0_75] : memref<16x32xf32, #tpu.memory_space<vmem>>, vector<2x32xf32>
    tpu.vector_store %arg11[%250, %c0_75], %249 {strides = array<i32>} : memref<16x32xf32, #tpu.memory_space<vmem>>, vector<2x32xf32>,
    %c1_i32_76 = arith.constant 1 : i32
    %c2_i32_77 = arith.constant 2 : i32
    %252 = arith.muli %c1_i32_76, %c2_i32_77 : i32
    %253 = tpu.assume_multiple %252, 2 : i32
    %254 = arith.index_cast %253 : i32 to index
    %c0_78 = arith.constant 0 : index
    %255 = vector.load %arg10[%254, %c0_78] : memref<16x128xf32, #tpu.memory_space<vmem>>, vector<2x128xf32>
    %256 = arith.truncf %249 : vector<2x32xf32> to vector<2x32xbf16>
    %cst_79 = arith.constant dense<0.000000e+00> : vector<2x128xf32>
    %257 = tpu.matmul %256, %217, %cst_79 {dimension_numbers = #tpu.dot_dimension_numbers<[1], [0], [0], [1], [0, 0, 1, 1], [], []>} : vector<2x32xbf16>, vector<32x128xbf16>, vector<2x128xf32> -> vector<2x128xf32>
    %258 = arith.addf %255, %257 : vector<2x128xf32>
    %259 = vector.extract_strided_slice %258 {offsets = [0, 0], sizes = [2, 96], strides = [1, 1]} : vector<2x128xf32> to vector<2x96xf32>
    %260 = arith.negf %259 : vector<2x96xf32>
    %261 = math.exp %260 : vector<2x96xf32>
    %cst_80 = arith.constant 1.000000e+00 : f32
    %262 = vector.broadcast %cst_80 : f32 to vector<2x96xf32>
    %263 = arith.addf %262, %261 : vector<2x96xf32>
    %264 = arith.divf %262, %263 : vector<2x96xf32>
    %265 = vector.extract_strided_slice %258 {offsets = [0, 96], sizes = [2, 32], strides = [1, 1]} : vector<2x128xf32> to vector<2x32xf32>
    %266 = math.tanh %265 : vector<2x32xf32>
    %267 = vector.extract_strided_slice %264 {offsets = [0, 0], sizes = [2, 32], strides = [1, 1]} : vector<2x96xf32> to vector<2x32xf32>
    %268 = vector.extract_strided_slice %264 {offsets = [0, 32], sizes = [2, 32], strides = [1, 1]} : vector<2x96xf32> to vector<2x32xf32>
    %269 = vector.extract_strided_slice %264 {offsets = [0, 64], sizes = [2, 32], strides = [1, 1]} : vector<2x96xf32> to vector<2x32xf32>
    %270 = arith.mulf %268, %247 : vector<2x32xf32>
    %271 = arith.mulf %267, %266 : vector<2x32xf32>
    %272 = arith.addf %270, %271 : vector<2x32xf32>
    %273 = math.tanh %272 : vector<2x32xf32>
    %274 = arith.mulf %269, %273 : vector<2x32xf32>
    %275 = arith.index_cast %253 : i32 to index
    %c0_81 = arith.constant 0 : index
    %276 = vector.load %arg11[%275, %c0_81] : memref<16x32xf32, #tpu.memory_space<vmem>>, vector<2x32xf32>
    tpu.vector_store %arg11[%275, %c0_81], %274 {strides = array<i32>} : memref<16x32xf32, #tpu.memory_space<vmem>>, vector<2x32xf32>,
    %c2_i32_82 = arith.constant 2 : i32
    %c2_i32_83 = arith.constant 2 : i32
    %277 = arith.muli %c2_i32_82, %c2_i32_83 : i32
    %278 = tpu.assume_multiple %277, 2 : i32
    %279 = arith.index_cast %278 : i32 to index
    %c0_84 = arith.constant 0 : index
    %280 = vector.load %arg10[%279, %c0_84] : memref<16x128xf32, #tpu.memory_space<vmem>>, vector<2x128xf32>
    %281 = arith.truncf %274 : vector<2x32xf32> to vector<2x32xbf16>
    %cst_85 = arith.constant dense<0.000000e+00> : vector<2x128xf32>
    %282 = tpu.matmul %281, %217, %cst_85 {dimension_numbers = #tpu.dot_dimension_numbers<[1], [0], [0], [1], [0, 0, 1, 1], [], []>} : vector<2x32xbf16>, vector<32x128xbf16>, vector<2x128xf32> -> vector<2x128xf32>
    %283 = arith.addf %280, %282 : vector<2x128xf32>
    %284 = vector.extract_strided_slice %283 {offsets = [0, 0], sizes = [2, 96], strides = [1, 1]} : vector<2x128xf32> to vector<2x96xf32>
    %285 = arith.negf %284 : vector<2x96xf32>
    %286 = math.exp %285 : vector<2x96xf32>
    %cst_86 = arith.constant 1.000000e+00 : f32
    %287 = vector.broadcast %cst_86 : f32 to vector<2x96xf32>
    %288 = arith.addf %287, %286 : vector<2x96xf32>
    %289 = arith.divf %287, %288 : vector<2x96xf32>
    %290 = vector.extract_strided_slice %283 {offsets = [0, 96], sizes = [2, 32], strides = [1, 1]} : vector<2x128xf32> to vector<2x32xf32>
    %291 = math.tanh %290 : vector<2x32xf32>
    %292 = vector.extract_strided_slice %289 {offsets = [0, 0], sizes = [2, 32], strides = [1, 1]} : vector<2x96xf32> to vector<2x32xf32>
    %293 = vector.extract_strided_slice %289 {offsets = [0, 32], sizes = [2, 32], strides = [1, 1]} : vector<2x96xf32> to vector<2x32xf32>
    %294 = vector.extract_strided_slice %289 {offsets = [0, 64], sizes = [2, 32], strides = [1, 1]} : vector<2x96xf32> to vector<2x32xf32>
    %295 = arith.mulf %293, %272 : vector<2x32xf32>
    %296 = arith.mulf %292, %291 : vector<2x32xf32>
    %297 = arith.addf %295, %296 : vector<2x32xf32>
    %298 = math.tanh %297 : vector<2x32xf32>
    %299 = arith.mulf %294, %298 : vector<2x32xf32>
    %300 = arith.index_cast %278 : i32 to index
    %c0_87 = arith.constant 0 : index
    %301 = vector.load %arg11[%300, %c0_87] : memref<16x32xf32, #tpu.memory_space<vmem>>, vector<2x32xf32>
    tpu.vector_store %arg11[%300, %c0_87], %299 {strides = array<i32>} : memref<16x32xf32, #tpu.memory_space<vmem>>, vector<2x32xf32>,
    %c3_i32_88 = arith.constant 3 : i32
    %c2_i32_89 = arith.constant 2 : i32
    %302 = arith.muli %c3_i32_88, %c2_i32_89 : i32
    %303 = tpu.assume_multiple %302, 2 : i32
    %304 = arith.index_cast %303 : i32 to index
    %c0_90 = arith.constant 0 : index
    %305 = vector.load %arg10[%304, %c0_90] : memref<16x128xf32, #tpu.memory_space<vmem>>, vector<2x128xf32>
    %306 = arith.truncf %299 : vector<2x32xf32> to vector<2x32xbf16>
    %cst_91 = arith.constant dense<0.000000e+00> : vector<2x128xf32>
    %307 = tpu.matmul %306, %217, %cst_91 {dimension_numbers = #tpu.dot_dimension_numbers<[1], [0], [0], [1], [0, 0, 1, 1], [], []>} : vector<2x32xbf16>, vector<32x128xbf16>, vector<2x128xf32> -> vector<2x128xf32>
    %308 = arith.addf %305, %307 : vector<2x128xf32>
    %309 = vector.extract_strided_slice %308 {offsets = [0, 0], sizes = [2, 96], strides = [1, 1]} : vector<2x128xf32> to vector<2x96xf32>
    %310 = arith.negf %309 : vector<2x96xf32>
    %311 = math.exp %310 : vector<2x96xf32>
    %cst_92 = arith.constant 1.000000e+00 : f32
    %312 = vector.broadcast %cst_92 : f32 to vector<2x96xf32>
    %313 = arith.addf %312, %311 : vector<2x96xf32>
    %314 = arith.divf %312, %313 : vector<2x96xf32>
    %315 = vector.extract_strided_slice %308 {offsets = [0, 96], sizes = [2, 32], strides = [1, 1]} : vector<2x128xf32> to vector<2x32xf32>
    %316 = math.tanh %315 : vector<2x32xf32>
    %317 = vector.extract_strided_slice %314 {offsets = [0, 0], sizes = [2, 32], strides = [1, 1]} : vector<2x96xf32> to vector<2x32xf32>
    %318 = vector.extract_strided_slice %314 {offsets = [0, 32], sizes = [2, 32], strides = [1, 1]} : vector<2x96xf32> to vector<2x32xf32>
    %319 = vector.extract_strided_slice %314 {offsets = [0, 64], sizes = [2, 32], strides = [1, 1]} : vector<2x96xf32> to vector<2x32xf32>
    %320 = arith.mulf %318, %297 : vector<2x32xf32>
    %321 = arith.mulf %317, %316 : vector<2x32xf32>
    %322 = arith.addf %320, %321 : vector<2x32xf32>
    %323 = math.tanh %322 : vector<2x32xf32>
    %324 = arith.mulf %319, %323 : vector<2x32xf32>
    %325 = arith.index_cast %303 : i32 to index
    %c0_93 = arith.constant 0 : index
    %326 = vector.load %arg11[%325, %c0_93] : memref<16x32xf32, #tpu.memory_space<vmem>>, vector<2x32xf32>
    tpu.vector_store %arg11[%325, %c0_93], %324 {strides = array<i32>} : memref<16x32xf32, #tpu.memory_space<vmem>>, vector<2x32xf32>,
    %c4_i32_94 = arith.constant 4 : i32
    %c2_i32_95 = arith.constant 2 : i32
    %327 = arith.muli %c4_i32_94, %c2_i32_95 : i32
    %328 = tpu.assume_multiple %327, 2 : i32
    %329 = arith.index_cast %328 : i32 to index
    %c0_96 = arith.constant 0 : index
    %330 = vector.load %arg10[%329, %c0_96] : memref<16x128xf32, #tpu.memory_space<vmem>>, vector<2x128xf32>
    %331 = arith.truncf %324 : vector<2x32xf32> to vector<2x32xbf16>
    %cst_97 = arith.constant dense<0.000000e+00> : vector<2x128xf32>
    %332 = tpu.matmul %331, %217, %cst_97 {dimension_numbers = #tpu.dot_dimension_numbers<[1], [0], [0], [1], [0, 0, 1, 1], [], []>} : vector<2x32xbf16>, vector<32x128xbf16>, vector<2x128xf32> -> vector<2x128xf32>
    %333 = arith.addf %330, %332 : vector<2x128xf32>
    %334 = vector.extract_strided_slice %333 {offsets = [0, 0], sizes = [2, 96], strides = [1, 1]} : vector<2x128xf32> to vector<2x96xf32>
    %335 = arith.negf %334 : vector<2x96xf32>
    %336 = math.exp %335 : vector<2x96xf32>
    %cst_98 = arith.constant 1.000000e+00 : f32
    %337 = vector.broadcast %cst_98 : f32 to vector<2x96xf32>
    %338 = arith.addf %337, %336 : vector<2x96xf32>
    %339 = arith.divf %337, %338 : vector<2x96xf32>
    %340 = vector.extract_strided_slice %333 {offsets = [0, 96], sizes = [2, 32], strides = [1, 1]} : vector<2x128xf32> to vector<2x32xf32>
    %341 = math.tanh %340 : vector<2x32xf32>
    %342 = vector.extract_strided_slice %339 {offsets = [0, 0], sizes = [2, 32], strides = [1, 1]} : vector<2x96xf32> to vector<2x32xf32>
    %343 = vector.extract_strided_slice %339 {offsets = [0, 32], sizes = [2, 32], strides = [1, 1]} : vector<2x96xf32> to vector<2x32xf32>
    %344 = vector.extract_strided_slice %339 {offsets = [0, 64], sizes = [2, 32], strides = [1, 1]} : vector<2x96xf32> to vector<2x32xf32>
    %345 = arith.mulf %343, %322 : vector<2x32xf32>
    %346 = arith.mulf %342, %341 : vector<2x32xf32>
    %347 = arith.addf %345, %346 : vector<2x32xf32>
    %348 = math.tanh %347 : vector<2x32xf32>
    %349 = arith.mulf %344, %348 : vector<2x32xf32>
    %350 = arith.index_cast %328 : i32 to index
    %c0_99 = arith.constant 0 : index
    %351 = vector.load %arg11[%350, %c0_99] : memref<16x32xf32, #tpu.memory_space<vmem>>, vector<2x32xf32>
    tpu.vector_store %arg11[%350, %c0_99], %349 {strides = array<i32>} : memref<16x32xf32, #tpu.memory_space<vmem>>, vector<2x32xf32>,
    %c5_i32_100 = arith.constant 5 : i32
    %c2_i32_101 = arith.constant 2 : i32
    %352 = arith.muli %c5_i32_100, %c2_i32_101 : i32
    %353 = tpu.assume_multiple %352, 2 : i32
    %354 = arith.index_cast %353 : i32 to index
    %c0_102 = arith.constant 0 : index
    %355 = vector.load %arg10[%354, %c0_102] : memref<16x128xf32, #tpu.memory_space<vmem>>, vector<2x128xf32>
    %356 = arith.truncf %349 : vector<2x32xf32> to vector<2x32xbf16>
    %cst_103 = arith.constant dense<0.000000e+00> : vector<2x128xf32>
    %357 = tpu.matmul %356, %217, %cst_103 {dimension_numbers = #tpu.dot_dimension_numbers<[1], [0], [0], [1], [0, 0, 1, 1], [], []>} : vector<2x32xbf16>, vector<32x128xbf16>, vector<2x128xf32> -> vector<2x128xf32>
    %358 = arith.addf %355, %357 : vector<2x128xf32>
    %359 = vector.extract_strided_slice %358 {offsets = [0, 0], sizes = [2, 96], strides = [1, 1]} : vector<2x128xf32> to vector<2x96xf32>
    %360 = arith.negf %359 : vector<2x96xf32>
    %361 = math.exp %360 : vector<2x96xf32>
    %cst_104 = arith.constant 1.000000e+00 : f32
    %362 = vector.broadcast %cst_104 : f32 to vector<2x96xf32>
    %363 = arith.addf %362, %361 : vector<2x96xf32>
    %364 = arith.divf %362, %363 : vector<2x96xf32>
    %365 = vector.extract_strided_slice %358 {offsets = [0, 96], sizes = [2, 32], strides = [1, 1]} : vector<2x128xf32> to vector<2x32xf32>
    %366 = math.tanh %365 : vector<2x32xf32>
    %367 = vector.extract_strided_slice %364 {offsets = [0, 0], sizes = [2, 32], strides = [1, 1]} : vector<2x96xf32> to vector<2x32xf32>
    %368 = vector.extract_strided_slice %364 {offsets = [0, 32], sizes = [2, 32], strides = [1, 1]} : vector<2x96xf32> to vector<2x32xf32>
    %369 = vector.extract_strided_slice %364 {offsets = [0, 64], sizes = [2, 32], strides = [1, 1]} : vector<2x96xf32> to vector<2x32xf32>
    %370 = arith.mulf %368, %347 : vector<2x32xf32>
    %371 = arith.mulf %367, %366 : vector<2x32xf32>
    %372 = arith.addf %370, %371 : vector<2x32xf32>
    %373 = math.tanh %372 : vector<2x32xf32>
    %374 = arith.mulf %369, %373 : vector<2x32xf32>
    %375 = arith.index_cast %353 : i32 to index
    %c0_105 = arith.constant 0 : index
    %376 = vector.load %arg11[%375, %c0_105] : memref<16x32xf32, #tpu.memory_space<vmem>>, vector<2x32xf32>
    tpu.vector_store %arg11[%375, %c0_105], %374 {strides = array<i32>} : memref<16x32xf32, #tpu.memory_space<vmem>>, vector<2x32xf32>,
    %c6_i32_106 = arith.constant 6 : i32
    %c2_i32_107 = arith.constant 2 : i32
    %377 = arith.muli %c6_i32_106, %c2_i32_107 : i32
    %378 = tpu.assume_multiple %377, 2 : i32
    %379 = arith.index_cast %378 : i32 to index
    %c0_108 = arith.constant 0 : index
    %380 = vector.load %arg10[%379, %c0_108] : memref<16x128xf32, #tpu.memory_space<vmem>>, vector<2x128xf32>
    %381 = arith.truncf %374 : vector<2x32xf32> to vector<2x32xbf16>
    %cst_109 = arith.constant dense<0.000000e+00> : vector<2x128xf32>
    %382 = tpu.matmul %381, %217, %cst_109 {dimension_numbers = #tpu.dot_dimension_numbers<[1], [0], [0], [1], [0, 0, 1, 1], [], []>} : vector<2x32xbf16>, vector<32x128xbf16>, vector<2x128xf32> -> vector<2x128xf32>
    %383 = arith.addf %380, %382 : vector<2x128xf32>
    %384 = vector.extract_strided_slice %383 {offsets = [0, 0], sizes = [2, 96], strides = [1, 1]} : vector<2x128xf32> to vector<2x96xf32>
    %385 = arith.negf %384 : vector<2x96xf32>
    %386 = math.exp %385 : vector<2x96xf32>
    %cst_110 = arith.constant 1.000000e+00 : f32
    %387 = vector.broadcast %cst_110 : f32 to vector<2x96xf32>
    %388 = arith.addf %387, %386 : vector<2x96xf32>
    %389 = arith.divf %387, %388 : vector<2x96xf32>
    %390 = vector.extract_strided_slice %383 {offsets = [0, 96], sizes = [2, 32], strides = [1, 1]} : vector<2x128xf32> to vector<2x32xf32>
    %391 = math.tanh %390 : vector<2x32xf32>
    %392 = vector.extract_strided_slice %389 {offsets = [0, 0], sizes = [2, 32], strides = [1, 1]} : vector<2x96xf32> to vector<2x32xf32>
    %393 = vector.extract_strided_slice %389 {offsets = [0, 32], sizes = [2, 32], strides = [1, 1]} : vector<2x96xf32> to vector<2x32xf32>
    %394 = vector.extract_strided_slice %389 {offsets = [0, 64], sizes = [2, 32], strides = [1, 1]} : vector<2x96xf32> to vector<2x32xf32>
    %395 = arith.mulf %393, %372 : vector<2x32xf32>
    %396 = arith.mulf %392, %391 : vector<2x32xf32>
    %397 = arith.addf %395, %396 : vector<2x32xf32>
    %398 = math.tanh %397 : vector<2x32xf32>
    %399 = arith.mulf %394, %398 : vector<2x32xf32>
    %400 = arith.index_cast %378 : i32 to index
    %c0_111 = arith.constant 0 : index
    %401 = vector.load %arg11[%400, %c0_111] : memref<16x32xf32, #tpu.memory_space<vmem>>, vector<2x32xf32>
    tpu.vector_store %arg11[%400, %c0_111], %399 {strides = array<i32>} : memref<16x32xf32, #tpu.memory_space<vmem>>, vector<2x32xf32>,
    %c7_i32_112 = arith.constant 7 : i32
    %c2_i32_113 = arith.constant 2 : i32
    %402 = arith.muli %c7_i32_112, %c2_i32_113 : i32
    %403 = tpu.assume_multiple %402, 2 : i32
    %404 = arith.index_cast %403 : i32 to index
    %c0_114 = arith.constant 0 : index
    %405 = vector.load %arg10[%404, %c0_114] : memref<16x128xf32, #tpu.memory_space<vmem>>, vector<2x128xf32>
    %406 = arith.truncf %399 : vector<2x32xf32> to vector<2x32xbf16>
    %cst_115 = arith.constant dense<0.000000e+00> : vector<2x128xf32>
    %407 = tpu.matmul %406, %217, %cst_115 {dimension_numbers = #tpu.dot_dimension_numbers<[1], [0], [0], [1], [0, 0, 1, 1], [], []>} : vector<2x32xbf16>, vector<32x128xbf16>, vector<2x128xf32> -> vector<2x128xf32>
    %408 = arith.addf %405, %407 : vector<2x128xf32>
    %409 = vector.extract_strided_slice %408 {offsets = [0, 0], sizes = [2, 96], strides = [1, 1]} : vector<2x128xf32> to vector<2x96xf32>
    %410 = arith.negf %409 : vector<2x96xf32>
    %411 = math.exp %410 : vector<2x96xf32>
    %cst_116 = arith.constant 1.000000e+00 : f32
    %412 = vector.broadcast %cst_116 : f32 to vector<2x96xf32>
    %413 = arith.addf %412, %411 : vector<2x96xf32>
    %414 = arith.divf %412, %413 : vector<2x96xf32>
    %415 = vector.extract_strided_slice %408 {offsets = [0, 96], sizes = [2, 32], strides = [1, 1]} : vector<2x128xf32> to vector<2x32xf32>
    %416 = math.tanh %415 : vector<2x32xf32>
    %417 = vector.extract_strided_slice %414 {offsets = [0, 0], sizes = [2, 32], strides = [1, 1]} : vector<2x96xf32> to vector<2x32xf32>
    %418 = vector.extract_strided_slice %414 {offsets = [0, 32], sizes = [2, 32], strides = [1, 1]} : vector<2x96xf32> to vector<2x32xf32>
    %419 = vector.extract_strided_slice %414 {offsets = [0, 64], sizes = [2, 32], strides = [1, 1]} : vector<2x96xf32> to vector<2x32xf32>
    %420 = arith.mulf %418, %397 : vector<2x32xf32>
    %421 = arith.mulf %417, %416 : vector<2x32xf32>
    %422 = arith.addf %420, %421 : vector<2x32xf32>
    %423 = math.tanh %422 : vector<2x32xf32>
    %424 = arith.mulf %419, %423 : vector<2x32xf32>
    %425 = arith.index_cast %403 : i32 to index
    %c0_117 = arith.constant 0 : index
    %426 = vector.load %arg11[%425, %c0_117] : memref<16x32xf32, #tpu.memory_space<vmem>>, vector<2x32xf32>
    tpu.vector_store %arg11[%425, %c0_117], %424 {strides = array<i32>} : memref<16x32xf32, #tpu.memory_space<vmem>>, vector<2x32xf32>,
    %c8_i32_118 = arith.constant 8 : i32
    %c1 = arith.constant 1 : index
    %c0_119 = arith.constant 0 : index
    %c0_120 = arith.constant 0 : index
    %427 = vector.load %arg8[%c1, %c0_119, %c0_120] : memref<2x2x32xf32, #tpu.memory_space<vmem>>, vector<1x2x32xf32>
    %428 = vector.shape_cast %427 : vector<1x2x32xf32> to vector<2x32xf32>
    %429 = vector.shape_cast %424 : vector<2x32xf32> to vector<1x2x32xf32>
    tpu.vector_store %arg8[%c1, %c0_119, %c0_120], %429 {strides = array<i32>} : memref<2x2x32xf32, #tpu.memory_space<vmem>>, vector<1x2x32xf32>,
    %c1_121 = arith.constant 1 : index
    %c0_122 = arith.constant 0 : index
    %c0_123 = arith.constant 0 : index
    %430 = vector.load %arg9[%c1_121, %c0_122, %c0_123] : memref<2x2x32xf32, #tpu.memory_space<vmem>>, vector<1x2x32xf32>
    %431 = vector.shape_cast %430 : vector<1x2x32xf32> to vector<2x32xf32>
    %432 = vector.shape_cast %422 : vector<2x32xf32> to vector<1x2x32xf32>
    tpu.vector_store %arg9[%c1_121, %c0_122, %c0_123], %432 {strides = array<i32>} : memref<2x2x32xf32, #tpu.memory_space<vmem>>, vector<1x2x32xf32>,
    %c0_124 = arith.constant 0 : index
    %c0_125 = arith.constant 0 : index
    %433 = vector.load %arg11[%c0_124, %c0_125] : memref<16x32xf32, #tpu.memory_space<vmem>>, vector<16x32xf32>
    %434 = arith.truncf %433 : vector<16x32xf32> to vector<16x32xbf16>
    %c0_126 = arith.constant 0 : index
    %c0_127 = arith.constant 0 : index
    %435 = vector.load %arg7[%c0_126, %c0_127] : memref<16x32xbf16, #tpu.memory_space<vmem>>, vector<16x32xbf16>
    tpu.vector_store %arg7[%c0_126, %c0_127], %434 {strides = array<i32>} : memref<16x32xbf16, #tpu.memory_space<vmem>>, vector<16x32xbf16>,
    return
  }
}

</mosaic_0001>

<bundles_post_ra>
// kernel: tpu_custom_call.1
= control target key start
LH: loop header
LB: loop body
LE: loop exit
PB: predicated region body
PF: predicated region fallthrough
CT: control target
= control target key end

     0   :  { %15 = vsyncpa [#allocation5], 0  ;;  %s2590_s0 = inlined_call_operand.hbm [shape: bf16[16,24], index: 0, kind: input, shape index: {}]   ;;  %s2591_s1 = inlined_call_operand.hbm [shape: bf16[24,128], index: 1, kind: input, shape index: {}]   ;;  %s2592_s2 = inlined_call_operand.hbm [shape: bf16[32,128], index: 2, kind: input, shape index: {}]   ;;  %s2593_s3 = inlined_call_operand.vmem [shape: f32[1,128], index: 3, kind: input, shape index: {}]   ;;  %s2594_s4 = inlined_call_operand.hbm [shape: bf16[32,128], index: 4, kind: input, shape index: {}]   ;;  %s2595_s5 = inlined_call_operand.hbm [shape: bf16[32,128], index: 5, kind: input, shape index: {}]   ;;  %s2596_s6 = inlined_call_operand.vmem [shape: f32[1,128], index: 6, kind: input, shape index: {}]   ;;  %s2597_s7 = inlined_call_operand.hbm [shape: bf16[16,32], index: 7, kind: output, shape index: {0}]   ;;  %s2598_s8 = inlined_call_operand.hbm [shape: f32[2,2,32], index: 8, kind: output, shape index: {1}]   ;;  %s2599_s9 = inlined_call_operand.hbm [shape: f32[2,2,32], index: 9, kind: output, shape index: {2}]  }
   0x1   :  { %16 = vsyncpa [#allocation8], 0 }
   0x2   :  { %17 = vsyncpa [#allocation11], 0 }
   0x3   :  { %18 = vsyncpa [#allocation6], 0 }
   0x4   :  { %19 = vsyncpa [#allocation15], 0  ;;  %s2179_s30 = smov [#allocation7]   ;;  %s2180_s11 = smov [#allocation10]  }
   0x5   :  { %s37_s10 = sshll.u32 %s2179_s30, 4  ;;  %s63_s12 = sshll.u32 %s2180_s11, 4  ;;  %s38_s10 = int_to_ptr.vmem [resolvable:$true] %s37_s10  ;;  %s64_s12 = int_to_ptr.vmem [resolvable:$true] %s63_s12 }
   0x6   :  { %s2017_s13 = scalar_lea.vmem %s38_s10, 192  ;;  %p2022_p1 = scmp.lt.s32.totalorder %s38_s10, %s38_s10 }
   0x7   :  { %p2018_p0 = scmp.ne.s32.totalorder %s38_s10, %s2017_s13  ;;  %p2023_p2 = scmp.lt.s32.totalorder %s2017_s13, %s2017_s13 }
   0x9   :  { %p2024_p3 = por %p2023_p2, %p2022_p1 }
   0xb   :  { %p2025_p4 = pnand %p2024_p3, %p2018_p0 }
   0xd   :  { %2028 = shalt.err (!%p2025_p4)
}
   0xe   :  { %s2181_s14 = smov 64   ;;  %s2182_s15 = smov 4  }
   0xf   :  { %43 = dma.hbm_to_vmem [thread:$0]  %s2591_s1, 192, %s38_s10, [#allocation8], %s2181_s14, %s2181_s14, %s2182_s15  }
  0x10   :  { %s2037_s18 = scalar_lea.vmem %s64_s12, 256  ;;  %p2042_p6 = scmp.lt.s32.totalorder %s64_s12, %s64_s12 }
  0x11   :  { %p2038_p5 = scmp.ne.s32.totalorder %s64_s12, %s2037_s18  ;;  %p2043_p7 = scmp.lt.s32.totalorder %s2037_s18, %s2037_s18 }
  0x13   :  { %p2044_p8 = por %p2043_p7, %p2042_p6 }
  0x15   :  { %p2045_p9 = pnand %p2044_p8, %p2038_p5 }
  0x17   :  { %2048 = shalt.err (!%p2045_p9)
}
  0x18   :  { %69 = dma.hbm_to_vmem [thread:$0]  %s2594_s4, 256, %s64_s12, [#allocation11], %s2181_s14, %s2181_s14, %s2182_s15  }
  0x19   :  { %s2183_s21 = smov [#allocation4]   ;;  %s2184_s23 = smov [#allocation9]  }
  0x1a   :  { %s25_s22 = sshll.u32 %s2183_s21, 4  ;;  %s49_s24 = sshll.u32 %s2184_s23, 4  ;;  %s26_s22 = int_to_ptr.vmem [resolvable:$true] %s25_s22  ;;  %s50_s24 = int_to_ptr.vmem [resolvable:$true] %s49_s24 }
  0x1b   :  { %s2057_s1 = scalar_lea.vmem %s26_s22, 128  ;;  %p2062_p11 = scmp.lt.s32.totalorder %s26_s22, %s26_s22 }
  0x1c   :  { %p2058_p10 = scmp.ne.s32.totalorder %s26_s22, %s2057_s1  ;;  %p2063_p12 = scmp.lt.s32.totalorder %s2057_s1, %s2057_s1 }
  0x1e   :  { %p2064_p13 = por %p2063_p12, %p2062_p11 }
  0x20   :  { %p2065_p0 = pnand %p2064_p13, %p2058_p10 }
  0x22   :  { %2068 = shalt.err (!%p2065_p0)
}
  0x23   :  { %31 = dma.hbm_to_vmem [thread:$0]  %s2590_s0, 128, %s26_s22, [#allocation5], %s2181_s14, %s2181_s14, %s2182_s15  }
  0x24   :  { %s2077_s4 = scalar_lea.vmem %s50_s24, 256  ;;  %p2082_p2 = scmp.lt.s32.totalorder %s50_s24, %s50_s24 }
  0x25   :  { %p2078_p1 = scmp.ne.s32.totalorder %s50_s24, %s2077_s4  ;;  %p2083_p3 = scmp.lt.s32.totalorder %s2077_s4, %s2077_s4 }
  0x27   :  { %p2084_p4 = por %p2083_p3, %p2082_p2 }
  0x29   :  { %p2085_p5 = pnand %p2084_p4, %p2078_p1 }
  0x2b   :  { %2088 = shalt.err (!%p2085_p5)
}
  0x2c   :  { %55 = dma.hbm_to_vmem [thread:$0]  %s2592_s2, 256, %s50_s24, [#allocation8], %s2181_s14, %s2181_s14, %s2182_s15  }
  0x2d   :  { %s2185_s29 = smov [#allocation12]  }
  0x2e   :  { %s75_s30 = sshll.u32 %s2185_s29, 4  ;;  %s76_s30 = int_to_ptr.vmem [resolvable:$true] %s75_s30 }
  0x2f   :  { %s2097_s10 = scalar_lea.vmem %s76_s30, 256  ;;  %p2102_p7 = scmp.lt.s32.totalorder %s76_s30, %s76_s30 }
  0x30   :  { %p2098_p6 = scmp.ne.s32.totalorder %s76_s30, %s2097_s10  ;;  %p2103_p8 = scmp.lt.s32.totalorder %s2097_s10, %s2097_s10 }
  0x32   :  { %p2104_p9 = por %p2103_p8, %p2102_p7 }
  0x34   :  { %p2105_p10 = pnand %p2104_p9, %p2098_p6 }
  0x36   :  { %2108 = shalt.err (!%p2105_p10)
}
  0x37   :  { %81 = dma.hbm_to_vmem [thread:$0]  %s2595_s5, 256, %s76_s30, [#allocation11], %s2181_s14, %s2181_s14, %s2182_s15  }
  0x38   :  { %2169 = dma.done.wait [#allocation5], 128  }
  0x39   :  { %2170 = vsyncadd [#allocation5], 4294967168 }
  0x3a   :  { %2171 = dma.done.wait [#allocation8], 448  }
  0x3b   :  { %2172 = vsyncadd [#allocation8], 4294966848 }
  0x3c   :  { %2173 = dma.done.wait [#allocation11], 512  }
  0x3d   :  { %2174 = vsyncadd [#allocation11], 4294966784  ;;  %v2186_v0 = vmov 0.0   ;;  %vm2187_vm0 = vmmov 0   ;;  %vm134_vm1 = vcmask 1043456   ;;  %v2281_v3 = vld [vmem:[#allocation9 + $0x8] sm:$0xff]  }
  0x3e   :  { %1712 = vmatprep.subr.bf16.mxu0 %v2186_v0  ;;  %1720 = vmatprep.subr.bf16.mxu1 %v2186_v0  ;;  %v1872_v1 = vld [vmem:[#allocation7 + $0x8] ss:$0 sps:$4 sm:$0xff]   ;;  %v1873_v4 = vld [vmem:[#allocation7] sm:$0xff]   ;;  %v1875_v5 = vld [vmem:[#allocation4] sm:$0xff]   ;;  %vm130_vm2 = vcmask 195584   ;;  %v2188_v7 = vmov 0  }
  0x3f   :  { %1716 = vmatprep.mubr.msk.bf16.mxu0 %vm2187_vm0, %v2186_v0  ;;  %1724 = vmatprep.mubr.msk.bf16.mxu1 %vm2187_vm0, %v2186_v0  ;;  %v136_v2 = vsel %vm134_vm1, %v1872_v1, 0  ;;  %v2285_v6 = vld [vmem:[#allocation9] sm:$0xff]   ;;  %v1611_v8 = vld [vmem:[%s2593_s3] ss:$0 sm:$0xff]  ;;  %s2189_s12 = smov 32   ;;  %vm194_vm3 = vcmask 261120  }
  0x40   :  { %1713 = vmatpush3.bf16.msra.mxu0 %v136_v2  ;;  %1721 = vmatpush3.bf16.msra.mxu1 %v2281_v3  ;;  %vm267_vm4 = vcmask 254976   ;;  %vm1558_vm5 = vcmask 257024   ;;  %s2191_s16 = smov [#allocation14]   ;;  %s2192_s18 = smov [#allocation16]  }
  0x41   :  { %1714 = vmatprep.subr.bf16.mxu0 %v2186_v0  ;;  %1722 = vmatprep.subr.bf16.mxu1 %v2186_v0  ;;  %s1578_s17 = sshll.u32 %s2191_s16, 4  ;;  %s1590_s19 = sshll.u32 %s2192_s18, 4  ;;  %s1579_s17 = int_to_ptr.vmem [resolvable:$true] %s1578_s17  ;;  %s1591_s19 = int_to_ptr.vmem [resolvable:$true] %s1590_s19 }
  0x42   :  { %s2109_s20 = scalar_lea.vmem %s1579_s17, 64  ;;  %p2114_p12 = scmp.lt.s32.totalorder %s1579_s17, %s1579_s17 }
  0x43   :  { %p2110_p11 = scmp.ne.s32.totalorder %s1579_s17, %s2109_s20  ;;  %p2115_p13 = scmp.lt.s32.totalorder %s2109_s20, %s2109_s20 }
  0x44   :  { %1715 = vmatpush3.bf16.msra.mxu0 %v1873_v4  ;;  %1723 = vmatpush3.bf16.msra.mxu1 %v2285_v6 }
  0x45   :  { %1728 = vmatprep.subr.bf16.mxu0 %v2186_v0  ;;  %1736 = vmatprep.subr.bf16.mxu1 %v2186_v0  ;;  %p2116_p0 = por %p2115_p13, %p2114_p12 }
  0x47   :  { %1717 = vmatmul.mubr.msk.bf16.vlgmr.msra.gmra.mxu0 %vm130_vm2, %v1875_v5  ;;  %1725 = vmatmul.mubr.bf16.vlgmr.msra.gmra.mxu1 %v2188_v7  ;;  %p2117_p1 = pnand %p2116_p0, %p2110_p11 }
  0x48   :  { %1729 = vmatpush3.bf16.msra.mxu0 %v2281_v3  ;;  %1732 = vmatprep.mubr.msk.bf16.mxu0 %vm2187_vm0, %v2186_v0 }
  0x49   :  { %1730 = vmatprep.subr.bf16.mxu0 %v2186_v0  ;;  %1737 = vmatpush3.bf16.msra.mxu1 %v2281_v3 }
  0x4a   :  { %1740 = vmatprep.mubr.msk.bf16.mxu1 %vm2187_vm0, %v2186_v0  ;;  %1738 = vmatprep.subr.bf16.mxu1 %v2186_v0 }
  0x4c   :  { %1731 = vmatpush3.bf16.msra.mxu0 %v2285_v6 }
  0x4d   :  { %1744 = vmatprep.subr.bf16.mxu0 %v2186_v0  ;;  %1739 = vmatpush3.bf16.msra.mxu1 %v2285_v6 }
  0x4e   :  { %1752 = vmatprep.subr.bf16.mxu1 %v2186_v0 }
 0x107   :  { %v172_v9 = vpop.f32.mrf.mxu0  ;;  %v232_v11 = vpop.f32.mrf.mxu1 }
 0x108   :  { %v173_v10 = vadd.f32 %v1611_v8, %v172_v9 }
 0x109   :  { %v1718_v12 = vpop.f32.mrf.mxu0  ;;  %v1726_v13 = vpop.f32.mrf.mxu1 }
 0x10a   :  { %179 = vst [vmem:[#allocation2] sm:$0xff] %v173_v10 }
 0x10b   :  { %v175_v14 = vpop.f32.mrf.mxu0  ;;  %v235_v16 = vpop.f32.mrf.mxu1 }
 0x10c   :  { %v176_v15 = vadd.f32 %v1611_v8, %v175_v14 }
 0x10d   :  { %v1719_v17 = vpop.f32.mrf.mxu0  ;;  %v1727_v18 = vpop.f32.mrf.mxu1 }
 0x10e   :  { %180 = vst [vmem:[#allocation2 + $0x8] sm:$0xff] %v176_v15 }
 0x111   :  { %v181_v19 = vld [vmem:[#allocation2] sm:$0x3]  ;;  %v270_v36 = vld [vmem:[#allocation2 + $0x2] sm:$0x3]  ;;  %v350_v57 = vld [vmem:[#allocation2 + $0x4] sm:$0x3] }
 0x112   :  { %v238_v20 = vadd.f32 %v232_v11, %v181_v19  ;;  %v430_v18 = vld [vmem:[#allocation2 + $0x6] sm:$0x3] }
 0x114   :  { %1881 = vtanh.f32 %v238_v20  ;;  %v1618_v22 = vmul.f32 -1.442695, %v238_v20 }
 0x116   :  { %1883 = vpow2.f32 %v1618_v22 }
 0x121   :  { %v1882_v21 = vpop.eup %1881 }
 0x122   :  { %248 = vrot.lane.b32.xlu0 %v1882_v21, %s2189_s12 }
 0x123   :  { %v1884_v23 = vpop.eup %1883 }
 0x124   :  { %v242_v24 = vadd.f32 1.0, %v1884_v23 }
 0x126   :  { %1885 = vrcp.f32 %v242_v24 }
 0x133   :  { %v1886_v25 = vpop.eup %1885 }
 0x134   :  { %v246_v28 = vmul.f32 0.0, %v1886_v25 }
 0x194   :  { %v249_v26 = vpop.permute.xlu0 %248 }
 0x195   :  { %v251_v27 = vmul.f32 %v1886_v25, %v249_v26 }
 0x197   :  { %253 = vrot.lane.b32.xlu0 %v251_v27, %s2189_s12 }
 0x209   :  { %v254_v29 = vpop.permute.xlu0 %253 }
 0x20a   :  { %v256_v30 = vadd.f32 %v254_v29, %v246_v28 }
 0x20c   :  { %1887 = vtanh.f32 %v256_v30 }
 0x219   :  { %v1888_v31 = vpop.eup %1887 }
 0x21a   :  { %259 = vrot.lane.b32.xlu1 %v1888_v31, %s2189_s12 }
 0x28c   :  { %v260_v32 = vpop.permute.xlu1 %259 }
 0x28d   :  { %v2310_v33 = vmul.f32 %v1886_v25, %v260_v32 }
 0x28f   :  { %v271_v34 = vpack.c.bf16 %v2310_v33, %v2310_v33 }
 0x291   :  { %273 = vrot.lane.b32.xlu1 %v271_v34, %s2181_s14 }
 0x303   :  { %v274_v35 = vpop.permute.xlu1 %273 }
 0x304   :  { %1733 = vmatmul.mubr.msk.bf16.vlgmr.msra.gmra.mxu0 %vm194_vm3, %v274_v35 }
 0x305   :  { %1745 = vmatpush3.bf16.msra.mxu0 %v2281_v3  ;;  %1748 = vmatprep.mubr.msk.bf16.mxu0 %vm2187_vm0, %v2186_v0 }
 0x306   :  { %1746 = vmatprep.subr.bf16.mxu0 %v2186_v0 }
 0x309   :  { %1747 = vmatpush3.bf16.msra.mxu0 %v2285_v6 }
 0x30a   :  { %1760 = vmatprep.subr.bf16.mxu0 %v2186_v0 }
 0x3c4   :  { %v312_v37 = vpop.f32.mrf.mxu0 }
 0x3c5   :  { %v318_v38 = vadd.f32 %v312_v37, %v270_v36 }
 0x3c6   :  { %v1734_v39 = vpop.f32.mrf.mxu0 }
 0x3c7   :  { %1889 = vtanh.f32 %v318_v38  ;;  %v1620_v43 = vmul.f32 -1.442695, %v318_v38 }
 0x3c8   :  { %v315_v40 = vpop.f32.mrf.mxu0 }
 0x3c9   :  { %1891 = vpow2.f32 %v1620_v43  ;;  %v510_v40 = vld [vmem:[#allocation2 + $0x8] sm:$0x3] }
 0x3ca   :  { %v1735_v41 = vpop.f32.mrf.mxu0 }
 0x3d4   :  { %v1890_v42 = vpop.eup %1889 }
 0x3d5   :  { %328 = vrot.lane.b32.xlu0 %v1890_v42, %s2189_s12 }
 0x3d6   :  { %v1892_v44 = vpop.eup %1891 }
 0x3d7   :  { %v322_v45 = vadd.f32 1.0, %v1892_v44 }
 0x3d9   :  { %1893 = vrcp.f32 %v322_v45 }
 0x3e6   :  { %v1894_v46 = vpop.eup %1893 }
 0x3e7   :  { %v326_v49 = vmul.f32 %v1894_v46, %v256_v30 }
 0x447   :  { %v329_v47 = vpop.permute.xlu0 %328 }
 0x448   :  { %v331_v48 = vmul.f32 %v1894_v46, %v329_v47 }
 0x44a   :  { %333 = vrot.lane.b32.xlu1 %v331_v48, %s2189_s12 }
 0x4bc   :  { %v334_v50 = vpop.permute.xlu1 %333 }
 0x4bd   :  { %v336_v51 = vadd.f32 %v334_v50, %v326_v49 }
 0x4bf   :  { %1895 = vtanh.f32 %v336_v51 }
 0x4cc   :  { %v1896_v52 = vpop.eup %1895 }
 0x4cd   :  { %339 = vrot.lane.b32.xlu0 %v1896_v52, %s2189_s12 }
 0x53f   :  { %v340_v53 = vpop.permute.xlu0 %339 }
 0x540   :  { %v2325_v54 = vmul.f32 %v1894_v46, %v340_v53 }
 0x542   :  { %v351_v55 = vpack.c.bf16 %v2325_v54, %v2325_v54 }
 0x544   :  { %353 = vrot.lane.b32.xlu1 %v351_v55, %s2181_s14 }
 0x5b6   :  { %v354_v56 = vpop.permute.xlu1 %353 }
 0x5b7   :  { %1741 = vmatmul.mubr.msk.bf16.vlgmr.msra.gmra.mxu1 %vm194_vm3, %v354_v56 }
 0x5b8   :  { %1753 = vmatpush3.bf16.msra.mxu1 %v2281_v3  ;;  %1756 = vmatprep.mubr.msk.bf16.mxu1 %vm2187_vm0, %v2186_v0 }
 0x5b9   :  { %1754 = vmatprep.subr.bf16.mxu1 %v2186_v0 }
 0x5bc   :  { %1755 = vmatpush3.bf16.msra.mxu1 %v2285_v6 }
 0x5bd   :  { %1768 = vmatprep.subr.bf16.mxu1 %v2186_v0 }
 0x677   :  { %v392_v58 = vpop.f32.mrf.mxu1 }
 0x678   :  { %v398_v59 = vadd.f32 %v392_v58, %v350_v57 }
 0x679   :  { %v1742_v60 = vpop.f32.mrf.mxu1 }
 0x67a   :  { %1897 = vtanh.f32 %v398_v59  ;;  %v1622_v1 = vmul.f32 -1.442695, %v398_v59 }
 0x67b   :  { %v395_v61 = vpop.f32.mrf.mxu1 }
 0x67c   :  { %1899 = vpow2.f32 %v1622_v1 }
 0x67d   :  { %v1743_v62 = vpop.f32.mrf.mxu1 }
 0x67e   :  { %v590_v62 = vld [vmem:[#allocation2 + $0xa] sm:$0x3] }
 0x687   :  { %v1898_v63 = vpop.eup %1897 }
 0x688   :  { %408 = vrot.lane.b32.xlu0 %v1898_v63, %s2189_s12 }
 0x689   :  { %v1900_v2 = vpop.eup %1899 }
 0x68a   :  { %v402_v4 = vadd.f32 1.0, %v1900_v2 }
 0x68c   :  { %1901 = vrcp.f32 %v402_v4 }
 0x699   :  { %v1902_v5 = vpop.eup %1901 }
 0x69a   :  { %v406_v10 = vmul.f32 %v1902_v5, %v336_v51 }
 0x6fa   :  { %v409_v8 = vpop.permute.xlu0 %408 }
 0x6fb   :  { %v411_v9 = vmul.f32 %v1902_v5, %v409_v8 }
 0x6fd   :  { %413 = vrot.lane.b32.xlu1 %v411_v9, %s2189_s12 }
 0x76f   :  { %v414_v11 = vpop.permute.xlu1 %413 }
 0x770   :  { %v416_v12 = vadd.f32 %v414_v11, %v406_v10 }
 0x772   :  { %1903 = vtanh.f32 %v416_v12 }
 0x77f   :  { %v1904_v13 = vpop.eup %1903 }
 0x780   :  { %419 = vrot.lane.b32.xlu0 %v1904_v13, %s2189_s12 }
 0x7f2   :  { %v420_v14 = vpop.permute.xlu0 %419 }
 0x7f3   :  { %v2340_v15 = vmul.f32 %v1902_v5, %v420_v14 }
 0x7f5   :  { %v431_v16 = vpack.c.bf16 %v2340_v15, %v2340_v15 }
 0x7f7   :  { %433 = vrot.lane.b32.xlu1 %v431_v16, %s2181_s14 }
 0x869   :  { %v434_v17 = vpop.permute.xlu1 %433 }
 0x86a   :  { %1749 = vmatmul.mubr.msk.bf16.vlgmr.msra.gmra.mxu0 %vm194_vm3, %v434_v17 }
 0x86b   :  { %1761 = vmatpush3.bf16.msra.mxu0 %v2281_v3  ;;  %1764 = vmatprep.mubr.msk.bf16.mxu0 %vm2187_vm0, %v2186_v0 }
 0x86c   :  { %1762 = vmatprep.subr.bf16.mxu0 %v2186_v0 }
 0x86f   :  { %1763 = vmatpush3.bf16.msra.mxu0 %v2285_v6 }
 0x870   :  { %1776 = vmatprep.subr.bf16.mxu0 %v2186_v0 }
 0x92a   :  { %v472_v19 = vpop.f32.mrf.mxu0 }
 0x92b   :  { %v478_v20 = vadd.f32 %v472_v19, %v430_v18 }
 0x92c   :  { %v1750_v21 = vpop.f32.mrf.mxu0 }
 0x92d   :  { %1905 = vtanh.f32 %v478_v20  ;;  %v1624_v25 = vmul.f32 -1.442695, %v478_v20 }
 0x92e   :  { %v475_v22 = vpop.f32.mrf.mxu0 }
 0x92f   :  { %1907 = vpow2.f32 %v1624_v25  ;;  %v670_v22 = vld [vmem:[#allocation2 + $0xc] sm:$0x3] }
 0x930   :  { %v1751_v23 = vpop.f32.mrf.mxu0 }
 0x93a   :  { %v1906_v24 = vpop.eup %1905 }
 0x93b   :  { %488 = vrot.lane.b32.xlu0 %v1906_v24, %s2189_s12 }
 0x93c   :  { %v1908_v26 = vpop.eup %1907 }
 0x93d   :  { %v482_v27 = vadd.f32 1.0, %v1908_v26 }
 0x93f   :  { %1909 = vrcp.f32 %v482_v27 }
 0x94c   :  { %v1910_v28 = vpop.eup %1909 }
 0x94d   :  { %v486_v31 = vmul.f32 %v1910_v28, %v416_v12 }
 0x9ad   :  { %v489_v29 = vpop.permute.xlu0 %488 }
 0x9ae   :  { %v491_v30 = vmul.f32 %v1910_v28, %v489_v29 }
 0x9b0   :  { %493 = vrot.lane.b32.xlu1 %v491_v30, %s2189_s12 }
 0xa22   :  { %v494_v32 = vpop.permute.xlu1 %493 }
 0xa23   :  { %v496_v34 = vadd.f32 %v494_v32, %v486_v31 }
 0xa25   :  { %1911 = vtanh.f32 %v496_v34 }
 0xa32   :  { %v1912_v35 = vpop.eup %1911 }
 0xa33   :  { %499 = vrot.lane.b32.xlu0 %v1912_v35, %s2189_s12 }
 0xaa5   :  { %v500_v36 = vpop.permute.xlu0 %499 }
 0xaa6   :  { %v2355_v37 = vmul.f32 %v1910_v28, %v500_v36 }
 0xaa8   :  { %v511_v38 = vpack.c.bf16 %v2355_v37, %v2355_v37 }
 0xaaa   :  { %513 = vrot.lane.b32.xlu1 %v511_v38, %s2181_s14 }
 0xb1c   :  { %v514_v39 = vpop.permute.xlu1 %513 }
 0xb1d   :  { %1757 = vmatmul.mubr.msk.bf16.vlgmr.msra.gmra.mxu1 %vm194_vm3, %v514_v39 }
 0xb1e   :  { %1769 = vmatpush3.bf16.msra.mxu1 %v2281_v3  ;;  %1772 = vmatprep.mubr.msk.bf16.mxu1 %vm2187_vm0, %v2186_v0 }
 0xb1f   :  { %1770 = vmatprep.subr.bf16.mxu1 %v2186_v0 }
 0xb22   :  { %1771 = vmatpush3.bf16.msra.mxu1 %v2285_v6 }
 0xb23   :  { %1784 = vmatprep.subr.bf16.mxu1 %v2186_v0 }
 0xbdd   :  { %v552_v41 = vpop.f32.mrf.mxu1 }
 0xbde   :  { %v558_v42 = vadd.f32 %v552_v41, %v510_v40 }
 0xbdf   :  { %v1758_v43 = vpop.f32.mrf.mxu1 }
 0xbe0   :  { %1913 = vtanh.f32 %v558_v42  ;;  %v1626_v47 = vmul.f32 -1.442695, %v558_v42 }
 0xbe1   :  { %v555_v44 = vpop.f32.mrf.mxu1 }
 0xbe2   :  { %1915 = vpow2.f32 %v1626_v47 }
 0xbe3   :  { %v1759_v45 = vpop.f32.mrf.mxu1 }
 0xbe4   :  { %v750_v45 = vld [vmem:[#allocation2 + $0xe] sm:$0x3] }
 0xbed   :  { %v1914_v46 = vpop.eup %1913 }
 0xbee   :  { %568 = vrot.lane.b32.xlu0 %v1914_v46, %s2189_s12 }
 0xbef   :  { %v1916_v48 = vpop.eup %1915 }
 0xbf0   :  { %v562_v49 = vadd.f32 1.0, %v1916_v48 }
 0xbf2   :  { %1917 = vrcp.f32 %v562_v49 }
 0xbff   :  { %v1918_v50 = vpop.eup %1917 }
 0xc00   :  { %v566_v53 = vmul.f32 %v1918_v50, %v496_v34 }
 0xc60   :  { %v569_v51 = vpop.permute.xlu0 %568 }
 0xc61   :  { %v571_v52 = vmul.f32 %v1918_v50, %v569_v51 }
 0xc63   :  { %573 = vrot.lane.b32.xlu1 %v571_v52, %s2189_s12 }
 0xcd5   :  { %v574_v55 = vpop.permute.xlu1 %573 }
 0xcd6   :  { %v576_v56 = vadd.f32 %v574_v55, %v566_v53 }
 0xcd8   :  { %1919 = vtanh.f32 %v576_v56 }
 0xce5   :  { %v1920_v57 = vpop.eup %1919 }
 0xce6   :  { %579 = vrot.lane.b32.xlu0 %v1920_v57, %s2189_s12 }
 0xd58   :  { %v580_v58 = vpop.permute.xlu0 %579 }
 0xd59   :  { %v2370_v59 = vmul.f32 %v1918_v50, %v580_v58 }
 0xd5b   :  { %v591_v60 = vpack.c.bf16 %v2370_v59, %v2370_v59 }
 0xd5d   :  { %593 = vrot.lane.b32.xlu1 %v591_v60, %s2181_s14 }
 0xdcf   :  { %v594_v61 = vpop.permute.xlu1 %593 }
 0xdd0   :  { %1765 = vmatmul.mubr.msk.bf16.vlgmr.msra.gmra.mxu0 %vm194_vm3, %v594_v61 }
 0xdd1   :  { %1777 = vmatpush3.bf16.msra.mxu0 %v2281_v3  ;;  %1780 = vmatprep.mubr.msk.bf16.mxu0 %vm2187_vm0, %v2186_v0 }
 0xdd2   :  { %1778 = vmatprep.subr.bf16.mxu0 %v2186_v0 }
 0xdd5   :  { %1779 = vmatpush3.bf16.msra.mxu0 %v2285_v6 }
 0xdd6   :  { %1792 = vmatprep.subr.bf16.mxu0 %v2186_v0 }
 0xe90   :  { %v632_v63 = vpop.f32.mrf.mxu0 }
 0xe91   :  { %v638_v1 = vadd.f32 %v632_v63, %v590_v62 }
 0xe92   :  { %v1766_v2 = vpop.f32.mrf.mxu0 }
 0xe93   :  { %1921 = vtanh.f32 %v638_v1  ;;  %v1628_v3 = vmul.f32 -1.442695, %v638_v1  ;;  %v1877_v2 = vld [vmem:[#allocation10 + $0x8] sm:$0xff]  }
 0xe94   :  { %v635_v4 = vpop.f32.mrf.mxu0 }
 0xe95   :  { %1923 = vpow2.f32 %v1628_v3  ;;  %v2423_v4 = vld [vmem:[#allocation12 + $0x8] sm:$0xff]  }
 0xe96   :  { %v1767_v5 = vpop.f32.mrf.mxu0 }
 0xe97   :  { %v1878_v5 = vld [vmem:[#allocation10] sm:$0xff]  }
 0xea0   :  { %v1922_v8 = vpop.eup %1921 }
 0xea1   :  { %648 = vrot.lane.b32.xlu0 %v1922_v8, %s2189_s12  ;;  %v2429_v8 = vld [vmem:[#allocation12] sm:$0xff]  }
 0xea2   :  { %v1924_v9 = vpop.eup %1923 }
 0xea3   :  { %v642_v10 = vadd.f32 1.0, %v1924_v9 }
 0xea5   :  { %1925 = vrcp.f32 %v642_v10 }
 0xeb2   :  { %v1926_v11 = vpop.eup %1925 }
 0xeb3   :  { %v646_v13 = vmul.f32 %v1926_v11, %v576_v56 }
 0xf13   :  { %v649_v12 = vpop.permute.xlu0 %648 }
 0xf14   :  { %v651_v6 = vmul.f32 %v1926_v11, %v649_v12 }
 0xf16   :  { %653 = vrot.lane.b32.xlu1 %v651_v6, %s2189_s12 }
 0xf88   :  { %v654_v14 = vpop.permute.xlu1 %653 }
 0xf89   :  { %v656_v16 = vadd.f32 %v654_v14, %v646_v13 }
 0xf8b   :  { %1927 = vtanh.f32 %v656_v16 }
 0xf98   :  { %v1928_v17 = vpop.eup %1927 }
 0xf99   :  { %659 = vrot.lane.b32.xlu0 %v1928_v17, %s2189_s12 }
0x100b   :  { %v660_v18 = vpop.permute.xlu0 %659 }
0x100c   :  { %v2385_v19 = vmul.f32 %v1926_v11, %v660_v18  ;;  %v1633_v18 = vld [vmem:[%s2596_s6] ss:$0 sm:$0xff]  ;;  %s2190_s6 = smov 96  }
0x100e   :  { %v671_v20 = vpack.c.bf16 %v2385_v19, %v2385_v19 }
0x1010   :  { %673 = vrot.lane.b32.xlu1 %v671_v20, %s2181_s14 }
0x1082   :  { %v674_v21 = vpop.permute.xlu1 %673 }
0x1083   :  { %1773 = vmatmul.mubr.msk.bf16.vlgmr.msra.gmra.mxu1 %vm194_vm3, %v674_v21 }
0x1084   :  { %1788 = vmatprep.mubr.msk.bf16.mxu1 %vm2187_vm0, %v2186_v0  ;;  %1785 = vmatpush3.bf16.msra.mxu1 %v1877_v2 }
0x1085   :  { %1786 = vmatprep.subr.bf16.mxu1 %v2186_v0 }
0x1088   :  { %1787 = vmatpush3.bf16.msra.mxu1 %v1878_v5 }
0x1089   :  { %1800 = vmatprep.subr.bf16.mxu1 %v2186_v0 }
0x1143   :  { %v712_v23 = vpop.f32.mrf.mxu1 }
0x1144   :  { %v718_v24 = vadd.f32 %v712_v23, %v670_v22 }
0x1145   :  { %v1774_v25 = vpop.f32.mrf.mxu1 }
0x1146   :  { %1929 = vtanh.f32 %v718_v24  ;;  %v1630_v29 = vmul.f32 -1.442695, %v718_v24 }
0x1147   :  { %v715_v26 = vpop.f32.mrf.mxu1 }
0x1148   :  { %1931 = vpow2.f32 %v1630_v29 }
0x1149   :  { %v1775_v27 = vpop.f32.mrf.mxu1 }
0x1153   :  { %v1930_v28 = vpop.eup %1929 }
0x1154   :  { %728 = vrot.lane.b32.xlu0 %v1930_v28, %s2189_s12 }
0x1155   :  { %v1932_v30 = vpop.eup %1931 }
0x1156   :  { %v722_v31 = vadd.f32 1.0, %v1932_v30 }
0x1158   :  { %1933 = vrcp.f32 %v722_v31 }
0x1165   :  { %v1934_v32 = vpop.eup %1933 }
0x1166   :  { %v726_v36 = vmul.f32 %v1934_v32, %v656_v16 }
0x11c6   :  { %v729_v34 = vpop.permute.xlu0 %728 }
0x11c7   :  { %v731_v35 = vmul.f32 %v1934_v32, %v729_v34 }
0x11c9   :  { %733 = vrot.lane.b32.xlu1 %v731_v35, %s2189_s12 }
0x123b   :  { %v734_v38 = vpop.permute.xlu1 %733 }
0x123c   :  { %v736_v39 = vadd.f32 %v734_v38, %v726_v36 }
0x123e   :  { %1935 = vtanh.f32 %v736_v39 }
0x124b   :  { %v1936_v40 = vpop.eup %1935 }
0x124c   :  { %739 = vrot.lane.b32.xlu0 %v1936_v40, %s2189_s12 }
0x12be   :  { %v740_v41 = vpop.permute.xlu0 %739 }
0x12bf   :  { %v742_v42 = vmul.f32 %v1934_v32, %v740_v41 }
0x12c1   :  { %v751_v43 = vpack.c.bf16 %v742_v42, %v742_v42 }
0x12c3   :  { %753 = vrot.lane.b32.xlu1 %v751_v43, %s2181_s14 }
0x1335   :  { %v754_v44 = vpop.permute.xlu1 %753 }
0x1336   :  { %1781 = vmatmul.mubr.msk.bf16.vlgmr.msra.gmra.mxu0 %vm194_vm3, %v754_v44 }
0x1337   :  { %1796 = vmatprep.mubr.msk.bf16.mxu0 %vm2187_vm0, %v2186_v0  ;;  %1793 = vmatpush3.bf16.msra.mxu0 %v2423_v4 }
0x1338   :  { %1794 = vmatprep.subr.bf16.mxu0 %v2186_v0 }
0x133b   :  { %1795 = vmatpush3.bf16.msra.mxu0 %v2429_v8 }
0x133c   :  { %1808 = vmatprep.subr.bf16.mxu0 %v2186_v0 }
0x133e   :  { %1797 = vmatmul.mubr.bf16.vlgmr.msra.gmra.mxu0 %v2188_v7 }
0x133f   :  { %1809 = vmatpush3.bf16.msra.mxu0 %v2423_v4  ;;  %1812 = vmatprep.mubr.msk.bf16.mxu0 %vm2187_vm0, %v2186_v0 }
0x1340   :  { %1810 = vmatprep.subr.bf16.mxu0 %v2186_v0 }
0x1343   :  { %1811 = vmatpush3.bf16.msra.mxu0 %v2429_v8 }
0x1344   :  { %1824 = vmatprep.subr.bf16.mxu0 %v2186_v0 }
0x13f6   :  { %v792_v46 = vpop.f32.mrf.mxu0 }
0x13f7   :  { %v798_v47 = vadd.f32 %v792_v46, %v750_v45 }
0x13f8   :  { %v1782_v48 = vpop.f32.mrf.mxu0 }
0x13f9   :  { %1937 = vtanh.f32 %v798_v47  ;;  %v1632_v52 = vmul.f32 -1.442695, %v798_v47 }
0x13fa   :  { %v795_v49 = vpop.f32.mrf.mxu0 }
0x13fb   :  { %1939 = vpow2.f32 %v1632_v52 }
0x13fc   :  { %v1783_v50 = vpop.f32.mrf.mxu0 }
0x13fe   :  { %v958_v13 = vpop.f32.mrf.mxu0 }
0x1400   :  { %v1798_v14 = vpop.f32.mrf.mxu0 }
0x1402   :  { %v961_v16 = vpop.f32.mrf.mxu0 }
0x1404   :  { %v1799_v17 = vpop.f32.mrf.mxu0 }
0x1406   :  { %v1938_v51 = vpop.eup %1937 }
0x1407   :  { %808 = vrot.lane.b32.xlu0 %v1938_v51, %s2189_s12 }
0x1408   :  { %v1940_v53 = vpop.eup %1939 }
0x1409   :  { %v802_v55 = vadd.f32 1.0, %v1940_v53 }
0x140b   :  { %1941 = vrcp.f32 %v802_v55 }
0x1418   :  { %v1942_v56 = vpop.eup %1941 }
0x1419   :  { %v806_v60 = vmul.f32 %v1942_v56, %v736_v39 }
0x1479   :  { %v809_v57 = vpop.permute.xlu0 %808 }
0x147a   :  { %v811_v58 = vmul.f32 %v1942_v56, %v809_v57 }
0x147c   :  { %813 = vrot.lane.b32.xlu1 %v811_v58, %s2189_s12 }
0x1480   :  { %264 = vrot.lane.b32.xlu1 %v2310_v33, %s2181_s14 }
0x1484   :  { %424 = vrot.lane.b32.xlu1 %v2340_v15, %s2181_s14 }
0x1488   :  { %584 = vrot.lane.b32.xlu1 %v2370_v59, %s2181_s14 }
0x148c   :  { %744 = vrot.lane.b32.xlu1 %v742_v42, %s2181_s14 }
0x14ee   :  { %v814_v61 = vpop.permute.xlu1 %813 }
0x14ef   :  { %v2409_v62 = vadd.f32 %v814_v61, %v806_v60 }
0x14f1   :  { %1943 = vtanh.f32 %v2409_v62 }
0x14f2   :  { %v265_v63 = vpop.permute.xlu1 %264 }
0x14f3   :  { %268 = vst.msk [vmem:[#allocation3] sm:$0x3] %vm267_vm4, %v265_v63 }
0x14f6   :  { %v425_v1 = vpop.permute.xlu1 %424 }
0x14f7   :  { %428 = vst.msk [vmem:[#allocation3 + $0x4] sm:$0x3] %vm267_vm4, %v425_v1 }
0x14fa   :  { %v585_v33 = vpop.permute.xlu1 %584 }
0x14fb   :  { %588 = vst.msk [vmem:[#allocation3 + $0x8] sm:$0x3] %vm267_vm4, %v585_v33 }
0x14fe   :  { %v1944_v15 = vpop.eup %1943  ;;  %v745_v59 = vpop.permute.xlu1 %744 }
0x14ff   :  { %748 = vst.msk [vmem:[#allocation3 + $0xc] sm:$0x3] %vm267_vm4, %v745_v59  ;;  %819 = vrot.lane.b32.xlu0 %v1944_v15, %s2189_s12 }
0x1503   :  { %344 = vrot.lane.b32.xlu0 %v2325_v54, %s2181_s14 }
0x1507   :  { %504 = vrot.lane.b32.xlu0 %v2355_v37, %s2181_s14 }
0x150b   :  { %664 = vrot.lane.b32.xlu0 %v2385_v19, %s2181_s14 }
0x1571   :  { %v820_v54 = vpop.permute.xlu0 %819 }
0x1572   :  { %v822_v37 = vmul.f32 %v1942_v56, %v820_v54 }
0x1574   :  { %824 = vrot.lane.b32.xlu0 %v822_v37, %s2181_s14 }
0x1575   :  { %v345_v3 = vpop.permute.xlu0 %344 }
0x1576   :  { %348 = vst.msk [vmem:[#allocation3 + $0x2] sm:$0x3] %vm267_vm4, %v345_v3 }
0x1579   :  { %v505_v9 = vpop.permute.xlu0 %504 }
0x157a   :  { %508 = vst.msk [vmem:[#allocation3 + $0x6] sm:$0x3] %vm267_vm4, %v505_v9 }
0x157d   :  { %v665_v10 = vpop.permute.xlu0 %664 }
0x157e   :  { %668 = vst.msk [vmem:[#allocation3 + $0xa] sm:$0x3] %vm267_vm4, %v665_v10 }
0x1581   :  { %v844_v7 = vld [vmem:[#allocation3] sm:$0xff] }
0x15e6   :  { %v825_v11 = vpop.permute.xlu0 %824 }
0x15e7   :  { %828 = vst.msk [vmem:[#allocation3 + $0xe] sm:$0x3] %vm267_vm4, %v825_v11  ;;  %829 = vst.msk [vmem:[#allocation14] sm:$0x3] %vm267_vm4, %v825_v11 }
0x15ee   :  { %v845_v12 = vld [vmem:[#allocation3 + $0x8] sm:$0xff] }
0x15ef   :  { %v846_v6 = vpack.c.bf16 %v845_v12, %v844_v7 }
0x15f1   :  { %1789 = vmatmul.mubr.msk.bf16.vlgmr.msra.gmra.mxu1 %vm194_vm3, %v846_v6 }
0x15f2   :  { %1801 = vmatpush3.bf16.msra.mxu1 %v2423_v4  ;;  %1804 = vmatprep.mubr.msk.bf16.mxu1 %vm2187_vm0, %v2186_v0 }
0x15f3   :  { %1802 = vmatprep.subr.bf16.mxu1 %v2186_v0 }
0x15f6   :  { %1803 = vmatpush3.bf16.msra.mxu1 %v2429_v8 }
0x15f7   :  { %1816 = vmatprep.subr.bf16.mxu1 %v2186_v0 }
0x16b1   :  { %v902_v19 = vpop.f32.mrf.mxu1 }
0x16b2   :  { %v903_v20 = vadd.f32 %v1633_v18, %v902_v19 }
0x16b3   :  { %v1790_v21 = vpop.f32.mrf.mxu1 }
0x16b4   :  { %909 = vst [vmem:[#allocation2] sm:$0xff] %v903_v20 }
0x16b5   :  { %v905_v22 = vpop.f32.mrf.mxu1 }
0x16b6   :  { %v906_v23 = vadd.f32 %v1633_v18, %v905_v22 }
0x16b7   :  { %v1791_v24 = vpop.f32.mrf.mxu1 }
0x16b8   :  { %910 = vst [vmem:[#allocation2 + $0x8] sm:$0xff] %v906_v23 }
0x16bb   :  { %v911_v25 = vld [vmem:[#allocation2] sm:$0x3]  ;;  %v994_v44 = vld [vmem:[#allocation2 + $0x2] sm:$0x3]  ;;  %v1072_v2 = vld [vmem:[#allocation2 + $0x4] sm:$0x3] }
0x16bc   :  { %v964_v26 = vadd.f32 %v958_v13, %v911_v25  ;;  %v1150_v24 = vld [vmem:[#allocation2 + $0x6] sm:$0x3] }
0x16be   :  { %1945 = vtanh.f32 %v964_v26  ;;  %v1639_v28 = vmul.f32 -1.442695, %v964_v26 }
0x16c0   :  { %1947 = vpow2.f32 %v1639_v28 }
0x16cb   :  { %v1946_v27 = vpop.eup %1945 }
0x16cc   :  { %974 = vrot.lane.b32.xlu1 %v1946_v27, %s2189_s12 }
0x16cd   :  { %v1948_v29 = vpop.eup %1947 }
0x16ce   :  { %v968_v30 = vadd.f32 1.0, %v1948_v29 }
0x16d0   :  { %1949 = vrcp.f32 %v968_v30 }
0x16dd   :  { %v1950_v31 = vpop.eup %1949 }
0x16de   :  { %v972_v35 = vmul.f32 0.0, %v1950_v31 }
0x173e   :  { %v975_v32 = vpop.permute.xlu1 %974 }
0x173f   :  { %v977_v34 = vmul.f32 %v1950_v31, %v975_v32 }
0x1741   :  { %979 = vrot.lane.b32.xlu0 %v977_v34, %s2189_s12 }
0x17b3   :  { %v980_v36 = vpop.permute.xlu0 %979 }
0x17b4   :  { %v982_v38 = vadd.f32 %v980_v36, %v972_v35 }
0x17b6   :  { %1951 = vtanh.f32 %v982_v38 }
0x17c3   :  { %v1952_v39 = vpop.eup %1951 }
0x17c4   :  { %985 = vrot.lane.b32.xlu1 %v1952_v39, %s2189_s12 }
0x1836   :  { %v986_v40 = vpop.permute.xlu1 %985 }
0x1837   :  { %v2459_v41 = vmul.f32 %v1950_v31, %v986_v40 }
0x1839   :  { %v995_v42 = vpack.c.bf16 %v2459_v41, %v2459_v41 }
0x183b   :  { %997 = vrot.lane.b32.xlu0 %v995_v42, %s2181_s14 }
0x18ad   :  { %v998_v43 = vpop.permute.xlu0 %997 }
0x18ae   :  { %1805 = vmatmul.mubr.msk.bf16.vlgmr.msra.gmra.mxu1 %vm194_vm3, %v998_v43 }
0x18af   :  { %1817 = vmatpush3.bf16.msra.mxu1 %v2423_v4  ;;  %1820 = vmatprep.mubr.msk.bf16.mxu1 %vm2187_vm0, %v2186_v0 }
0x18b0   :  { %1818 = vmatprep.subr.bf16.mxu1 %v2186_v0 }
0x18b3   :  { %1819 = vmatpush3.bf16.msra.mxu1 %v2429_v8 }
0x18b4   :  { %1832 = vmatprep.subr.bf16.mxu1 %v2186_v0 }
0x196e   :  { %v1036_v45 = vpop.f32.mrf.mxu1 }
0x196f   :  { %v1042_v46 = vadd.f32 %v1036_v45, %v994_v44 }
0x1970   :  { %v1806_v47 = vpop.f32.mrf.mxu1 }
0x1971   :  { %1953 = vtanh.f32 %v1042_v46  ;;  %v1641_v51 = vmul.f32 -1.442695, %v1042_v46 }
0x1972   :  { %v1039_v48 = vpop.f32.mrf.mxu1 }
0x1973   :  { %1955 = vpow2.f32 %v1641_v51  ;;  %v1228_v48 = vld [vmem:[#allocation2 + $0x8] sm:$0x3] }
0x1974   :  { %v1807_v49 = vpop.f32.mrf.mxu1 }
0x197e   :  { %v1954_v50 = vpop.eup %1953 }
0x197f   :  { %1052 = vrot.lane.b32.xlu1 %v1954_v50, %s2189_s12 }
0x1980   :  { %v1956_v52 = vpop.eup %1955 }
0x1981   :  { %v1046_v53 = vadd.f32 1.0, %v1956_v52 }
0x1983   :  { %1957 = vrcp.f32 %v1046_v53 }
0x1990   :  { %v1958_v55 = vpop.eup %1957 }
0x1991   :  { %v1050_v58 = vmul.f32 %v1958_v55, %v982_v38 }
0x19f1   :  { %v1053_v56 = vpop.permute.xlu1 %1052 }
0x19f2   :  { %v1055_v57 = vmul.f32 %v1958_v55, %v1053_v56 }
0x19f4   :  { %1057 = vrot.lane.b32.xlu0 %v1055_v57, %s2189_s12 }
0x1a66   :  { %v1058_v60 = vpop.permute.xlu0 %1057 }
0x1a67   :  { %v1060_v61 = vadd.f32 %v1058_v60, %v1050_v58 }
0x1a69   :  { %1959 = vtanh.f32 %v1060_v61 }
0x1a76   :  { %v1960_v63 = vpop.eup %1959 }
0x1a77   :  { %1063 = vrot.lane.b32.xlu1 %v1960_v63, %s2189_s12 }
0x1ae9   :  { %v1064_v1 = vpop.permute.xlu1 %1063 }
0x1aea   :  { %v2474_v33 = vmul.f32 %v1958_v55, %v1064_v1 }
0x1aec   :  { %v1073_v15 = vpack.c.bf16 %v2474_v33, %v2474_v33 }
0x1aee   :  { %1075 = vrot.lane.b32.xlu0 %v1073_v15, %s2181_s14 }
0x1b60   :  { %v1076_v59 = vpop.permute.xlu0 %1075 }
0x1b61   :  { %1813 = vmatmul.mubr.msk.bf16.vlgmr.msra.gmra.mxu0 %vm194_vm3, %v1076_v59 }
0x1b62   :  { %1825 = vmatpush3.bf16.msra.mxu0 %v2423_v4  ;;  %1828 = vmatprep.mubr.msk.bf16.mxu0 %vm2187_vm0, %v2186_v0 }
0x1b63   :  { %1826 = vmatprep.subr.bf16.mxu0 %v2186_v0 }
0x1b66   :  { %1827 = vmatpush3.bf16.msra.mxu0 %v2429_v8 }
0x1b67   :  { %1840 = vmatprep.subr.bf16.mxu0 %v2186_v0 }
0x1c21   :  { %v1114_v5 = vpop.f32.mrf.mxu0 }
0x1c22   :  { %v1120_v54 = vadd.f32 %v1114_v5, %v1072_v2 }
0x1c23   :  { %v1814_v37 = vpop.f32.mrf.mxu0 }
0x1c24   :  { %1961 = vtanh.f32 %v1120_v54  ;;  %v1643_v11 = vmul.f32 -1.442695, %v1120_v54 }
0x1c25   :  { %v1117_v3 = vpop.f32.mrf.mxu0 }
0x1c26   :  { %1963 = vpow2.f32 %v1643_v11 }
0x1c27   :  { %v1815_v9 = vpop.f32.mrf.mxu0 }
0x1c28   :  { %v1306_v9 = vld [vmem:[#allocation2 + $0xa] sm:$0x3] }
0x1c31   :  { %v1962_v10 = vpop.eup %1961 }
0x1c32   :  { %1130 = vrot.lane.b32.xlu1 %v1962_v10, %s2189_s12 }
0x1c33   :  { %v1964_v7 = vpop.eup %1963 }
0x1c34   :  { %v1124_v12 = vadd.f32 1.0, %v1964_v7 }
0x1c36   :  { %1965 = vrcp.f32 %v1124_v12 }
0x1c43   :  { %v1966_v6 = vpop.eup %1965 }
0x1c44   :  { %v1128_v16 = vmul.f32 %v1966_v6, %v1060_v61 }
0x1ca4   :  { %v1131_v13 = vpop.permute.xlu1 %1130 }
0x1ca5   :  { %v1133_v14 = vmul.f32 %v1966_v6, %v1131_v13 }
0x1ca7   :  { %1135 = vrot.lane.b32.xlu0 %v1133_v14, %s2189_s12 }
0x1d19   :  { %v1136_v17 = vpop.permute.xlu0 %1135 }
0x1d1a   :  { %v1138_v18 = vadd.f32 %v1136_v17, %v1128_v16 }
0x1d1c   :  { %1967 = vtanh.f32 %v1138_v18 }
0x1d29   :  { %v1968_v19 = vpop.eup %1967 }
0x1d2a   :  { %1141 = vrot.lane.b32.xlu1 %v1968_v19, %s2189_s12 }
0x1d9c   :  { %v1142_v20 = vpop.permute.xlu1 %1141 }
0x1d9d   :  { %v2489_v21 = vmul.f32 %v1966_v6, %v1142_v20 }
0x1d9f   :  { %v1151_v22 = vpack.c.bf16 %v2489_v21, %v2489_v21 }
0x1da1   :  { %1153 = vrot.lane.b32.xlu0 %v1151_v22, %s2181_s14 }
0x1e13   :  { %v1154_v23 = vpop.permute.xlu0 %1153 }
0x1e14   :  { %1821 = vmatmul.mubr.msk.bf16.vlgmr.msra.gmra.mxu1 %vm194_vm3, %v1154_v23 }
0x1e15   :  { %1833 = vmatpush3.bf16.msra.mxu1 %v2423_v4  ;;  %1836 = vmatprep.mubr.msk.bf16.mxu1 %vm2187_vm0, %v2186_v0 }
0x1e16   :  { %1834 = vmatprep.subr.bf16.mxu1 %v2186_v0 }
0x1e19   :  { %1835 = vmatpush3.bf16.msra.mxu1 %v2429_v8 }
0x1e1a   :  { %1848 = vmatprep.subr.bf16.mxu1 %v2186_v0 }
0x1ed4   :  { %v1192_v25 = vpop.f32.mrf.mxu1 }
0x1ed5   :  { %v1198_v26 = vadd.f32 %v1192_v25, %v1150_v24 }
0x1ed6   :  { %v1822_v27 = vpop.f32.mrf.mxu1 }
0x1ed7   :  { %1969 = vtanh.f32 %v1198_v26  ;;  %v1645_v31 = vmul.f32 -1.442695, %v1198_v26  ;;  %v1384_v27 = vld [vmem:[#allocation2 + $0xc] sm:$0x3] }
0x1ed8   :  { %v1195_v28 = vpop.f32.mrf.mxu1 }
0x1ed9   :  { %1971 = vpow2.f32 %v1645_v31 }
0x1eda   :  { %v1823_v29 = vpop.f32.mrf.mxu1 }
0x1ee4   :  { %v1970_v30 = vpop.eup %1969 }
0x1ee5   :  { %1208 = vrot.lane.b32.xlu1 %v1970_v30, %s2189_s12 }
0x1ee6   :  { %v1972_v32 = vpop.eup %1971 }
0x1ee7   :  { %v1202_v34 = vadd.f32 1.0, %v1972_v32 }
0x1ee9   :  { %1973 = vrcp.f32 %v1202_v34 }
0x1ef6   :  { %v1974_v35 = vpop.eup %1973 }
0x1ef7   :  { %v1206_v39 = vmul.f32 %v1974_v35, %v1138_v18 }
0x1f57   :  { %v1209_v36 = vpop.permute.xlu1 %1208 }
0x1f58   :  { %v1211_v38 = vmul.f32 %v1974_v35, %v1209_v36 }
0x1f5a   :  { %1213 = vrot.lane.b32.xlu0 %v1211_v38, %s2189_s12 }
0x1fcc   :  { %v1214_v40 = vpop.permute.xlu0 %1213 }
0x1fcd   :  { %v1216_v42 = vadd.f32 %v1214_v40, %v1206_v39 }
0x1fcf   :  { %1975 = vtanh.f32 %v1216_v42 }
0x1fdc   :  { %v1976_v43 = vpop.eup %1975 }
0x1fdd   :  { %1219 = vrot.lane.b32.xlu1 %v1976_v43, %s2189_s12 }
0x204f   :  { %v1220_v44 = vpop.permute.xlu1 %1219 }
0x2050   :  { %v2504_v45 = vmul.f32 %v1974_v35, %v1220_v44 }
0x2052   :  { %v1229_v46 = vpack.c.bf16 %v2504_v45, %v2504_v45 }
0x2054   :  { %1231 = vrot.lane.b32.xlu0 %v1229_v46, %s2181_s14 }
0x20c6   :  { %v1232_v47 = vpop.permute.xlu0 %1231 }
0x20c7   :  { %1829 = vmatmul.mubr.msk.bf16.vlgmr.msra.gmra.mxu0 %vm194_vm3, %v1232_v47 }
0x20c8   :  { %1841 = vmatpush3.bf16.msra.mxu0 %v2423_v4  ;;  %1844 = vmatprep.mubr.msk.bf16.mxu0 %vm2187_vm0, %v2186_v0 }
0x20c9   :  { %1842 = vmatprep.subr.bf16.mxu0 %v2186_v0 }
0x20cc   :  { %1843 = vmatpush3.bf16.msra.mxu0 %v2429_v8 }
0x2187   :  { %v1270_v49 = vpop.f32.mrf.mxu0 }
0x2188   :  { %v1276_v50 = vadd.f32 %v1270_v49, %v1228_v48 }
0x2189   :  { %v1830_v51 = vpop.f32.mrf.mxu0 }
0x218a   :  { %1977 = vtanh.f32 %v1276_v50  ;;  %v1647_v56 = vmul.f32 -1.442695, %v1276_v50 }
0x218b   :  { %v1273_v52 = vpop.f32.mrf.mxu0 }
0x218c   :  { %1979 = vpow2.f32 %v1647_v56  ;;  %v1462_v52 = vld [vmem:[#allocation2 + $0xe] sm:$0x3] }
0x218d   :  { %v1831_v53 = vpop.f32.mrf.mxu0 }
0x2197   :  { %v1978_v55 = vpop.eup %1977 }
0x2198   :  { %1286 = vrot.lane.b32.xlu1 %v1978_v55, %s2189_s12 }
0x2199   :  { %v1980_v57 = vpop.eup %1979 }
0x219a   :  { %v1280_v58 = vadd.f32 1.0, %v1980_v57 }
0x219c   :  { %1981 = vrcp.f32 %v1280_v58 }
0x21a9   :  { %v1982_v60 = vpop.eup %1981 }
0x21aa   :  { %v1284_v1 = vmul.f32 %v1982_v60, %v1216_v42 }
0x220a   :  { %v1287_v61 = vpop.permute.xlu1 %1286 }
0x220b   :  { %v1289_v63 = vmul.f32 %v1982_v60, %v1287_v61 }
0x220d   :  { %1291 = vrot.lane.b32.xlu0 %v1289_v63, %s2189_s12 }
0x227f   :  { %v1292_v15 = vpop.permute.xlu0 %1291 }
0x2280   :  { %v1294_v59 = vadd.f32 %v1292_v15, %v1284_v1 }
0x2282   :  { %1983 = vtanh.f32 %v1294_v59 }
0x228f   :  { %v1984_v2 = vpop.eup %1983 }
0x2290   :  { %1297 = vrot.lane.b32.xlu1 %v1984_v2, %s2189_s12 }
0x2302   :  { %v1298_v5 = vpop.permute.xlu1 %1297 }
0x2303   :  { %v2518_v54 = vmul.f32 %v1982_v60, %v1298_v5 }
0x2305   :  { %v1307_v37 = vpack.c.bf16 %v2518_v54, %v2518_v54 }
0x2307   :  { %1309 = vrot.lane.b32.xlu0 %v1307_v37, %s2181_s14 }
0x2379   :  { %v1310_v3 = vpop.permute.xlu0 %1309 }
0x237a   :  { %1837 = vmatmul.mubr.msk.bf16.vlgmr.msra.gmra.mxu1 %vm194_vm3, %v1310_v3 }
0x237b   :  { %1849 = vmatpush3.bf16.msra.mxu1 %v2423_v4  ;;  %1852 = vmatprep.mubr.msk.bf16.mxu1 %vm2187_vm0, %v2186_v0 }
0x237c   :  { %1850 = vmatprep.subr.bf16.mxu1 %v2186_v0 }
0x237f   :  { %1851 = vmatpush3.bf16.msra.mxu1 %v2429_v8 }
0x243a   :  { %v1348_v10 = vpop.f32.mrf.mxu1 }
0x243b   :  { %v1354_v11 = vadd.f32 %v1348_v10, %v1306_v9 }
0x243c   :  { %v1838_v7 = vpop.f32.mrf.mxu1 }
0x243d   :  { %1985 = vtanh.f32 %v1354_v11  ;;  %v1649_v14 = vmul.f32 -1.442695, %v1354_v11 }
0x243e   :  { %v1351_v12 = vpop.f32.mrf.mxu1 }
0x243f   :  { %1987 = vpow2.f32 %v1649_v14 }
0x2440   :  { %v1839_v6 = vpop.f32.mrf.mxu1 }
0x244a   :  { %v1986_v13 = vpop.eup %1985 }
0x244b   :  { %1364 = vrot.lane.b32.xlu1 %v1986_v13, %s2189_s12 }
0x244c   :  { %v1988_v4 = vpop.eup %1987 }
0x244d   :  { %v1358_v16 = vadd.f32 1.0, %v1988_v4 }
0x244f   :  { %1989 = vrcp.f32 %v1358_v16 }
0x245c   :  { %v1990_v17 = vpop.eup %1989 }
0x245d   :  { %v1362_v8 = vmul.f32 %v1990_v17, %v1294_v59 }
0x24bd   :  { %v1365_v18 = vpop.permute.xlu1 %1364 }
0x24be   :  { %v1367_v0 = vmul.f32 %v1990_v17, %v1365_v18 }
0x24c0   :  { %1369 = vrot.lane.b32.xlu0 %v1367_v0, %s2189_s12 }
0x2532   :  { %v1370_v19 = vpop.permute.xlu0 %1369 }
0x2533   :  { %v1372_v20 = vadd.f32 %v1370_v19, %v1362_v8 }
0x2535   :  { %1991 = vtanh.f32 %v1372_v20 }
0x2542   :  { %v1992_v22 = vpop.eup %1991 }
0x2543   :  { %1375 = vrot.lane.b32.xlu1 %v1992_v22, %s2189_s12 }
0x25b5   :  { %v1376_v23 = vpop.permute.xlu1 %1375 }
0x25b6   :  { %v2532_v24 = vmul.f32 %v1990_v17, %v1376_v23 }
0x25b8   :  { %v1385_v25 = vpack.c.bf16 %v2532_v24, %v2532_v24 }
0x25ba   :  { %1387 = vrot.lane.b32.xlu0 %v1385_v25, %s2181_s14 }
0x262c   :  { %v1388_v26 = vpop.permute.xlu0 %1387 }
0x262d   :  { %1845 = vmatmul.mubr.msk.bf16.vlgmr.msra.gmra.mxu0 %vm194_vm3, %v1388_v26 }
0x26ed   :  { %v1426_v28 = vpop.f32.mrf.mxu0 }
0x26ee   :  { %v1432_v29 = vadd.f32 %v1426_v28, %v1384_v27 }
0x26ef   :  { %v1846_v30 = vpop.f32.mrf.mxu0 }
0x26f0   :  { %1993 = vtanh.f32 %v1432_v29  ;;  %v1651_v35 = vmul.f32 -1.442695, %v1432_v29 }
0x26f1   :  { %v1429_v31 = vpop.f32.mrf.mxu0 }
0x26f2   :  { %1995 = vpow2.f32 %v1651_v35 }
0x26f3   :  { %v1847_v32 = vpop.f32.mrf.mxu0 }
0x26fd   :  { %v1994_v34 = vpop.eup %1993 }
0x26fe   :  { %1442 = vrot.lane.b32.xlu1 %v1994_v34, %s2189_s12 }
0x26ff   :  { %v1996_v36 = vpop.eup %1995 }
0x2700   :  { %v1436_v38 = vadd.f32 1.0, %v1996_v36 }
0x2702   :  { %1997 = vrcp.f32 %v1436_v38 }
0x270f   :  { %v1998_v39 = vpop.eup %1997 }
0x2710   :  { %v1440_v43 = vmul.f32 %v1998_v39, %v1372_v20 }
0x2770   :  { %v1443_v40 = vpop.permute.xlu1 %1442 }
0x2771   :  { %v1445_v42 = vmul.f32 %v1998_v39, %v1443_v40 }
0x2773   :  { %1447 = vrot.lane.b32.xlu0 %v1445_v42, %s2189_s12 }
0x27e5   :  { %v1448_v44 = vpop.permute.xlu0 %1447 }
0x27e6   :  { %v1450_v46 = vadd.f32 %v1448_v44, %v1440_v43 }
0x27e8   :  { %1999 = vtanh.f32 %v1450_v46 }
0x27f5   :  { %v2000_v47 = vpop.eup %1999 }
0x27f6   :  { %1453 = vrot.lane.b32.xlu1 %v2000_v47, %s2189_s12 }
0x2868   :  { %v1454_v48 = vpop.permute.xlu1 %1453 }
0x2869   :  { %v1456_v49 = vmul.f32 %v1998_v39, %v1454_v48 }
0x286b   :  { %v1463_v50 = vpack.c.bf16 %v1456_v49, %v1456_v49 }
0x286d   :  { %1465 = vrot.lane.b32.xlu0 %v1463_v50, %s2181_s14 }
0x28df   :  { %v1466_v51 = vpop.permute.xlu0 %1465 }
0x28e0   :  { %1853 = vmatmul.mubr.msk.bf16.vlgmr.msra.gmra.mxu1 %vm194_vm3, %v1466_v51 }
0x29a0   :  { %v1504_v53 = vpop.f32.mrf.mxu1 }
0x29a1   :  { %v1510_v55 = vadd.f32 %v1504_v53, %v1462_v52 }
0x29a2   :  { %v1854_v56 = vpop.f32.mrf.mxu1 }
0x29a3   :  { %2001 = vtanh.f32 %v1510_v55  ;;  %v1653_v61 = vmul.f32 -1.442695, %v1510_v55 }
0x29a4   :  { %v1507_v57 = vpop.f32.mrf.mxu1 }
0x29a5   :  { %2003 = vpow2.f32 %v1653_v61 }
0x29a6   :  { %v1855_v58 = vpop.f32.mrf.mxu1 }
0x29b0   :  { %v2002_v60 = vpop.eup %2001 }
0x29b1   :  { %1520 = vrot.lane.b32.xlu1 %v2002_v60, %s2189_s12 }
0x29b2   :  { %v2004_v63 = vpop.eup %2003 }
0x29b3   :  { %v1514_v1 = vadd.f32 1.0, %v2004_v63 }
0x29b5   :  { %2005 = vrcp.f32 %v1514_v1 }
0x29c2   :  { %v2006_v15 = vpop.eup %2005 }
0x29c3   :  { %v1518_v5 = vmul.f32 %v2006_v15, %v1450_v46 }
0x2a23   :  { %v1521_v59 = vpop.permute.xlu1 %1520 }
0x2a24   :  { %v1523_v2 = vmul.f32 %v2006_v15, %v1521_v59 }
0x2a26   :  { %1525 = vrot.lane.b32.xlu0 %v1523_v2, %s2189_s12 }
0x2a2a   :  { %990 = vrot.lane.b32.xlu0 %v2459_v41, %s2181_s14 }
0x2a2e   :  { %1146 = vrot.lane.b32.xlu0 %v2489_v21, %s2181_s14 }
0x2a32   :  { %1302 = vrot.lane.b32.xlu0 %v2518_v54, %s2181_s14 }
0x2a36   :  { %1458 = vrot.lane.b32.xlu0 %v1456_v49, %s2181_s14 }
0x2a3a   :  { %831 = vrot.lane.b32.xlu0 %v2409_v62, %s2190_s6 }
0x2a98   :  { %v1526_v37 = vpop.permute.xlu0 %1525 }
0x2a99   :  { %v1528_v3 = vadd.f32 %v1526_v37, %v1518_v5 }
0x2a9b   :  { %2007 = vtanh.f32 %v1528_v3 }
0x2a9c   :  { %v991_v9 = vpop.permute.xlu0 %990 }
0x2a9d   :  { %993 = vst.msk [vmem:[#allocation3] sm:$0x3] %vm267_vm4, %v991_v9 }
0x2aa0   :  { %v1147_v10 = vpop.permute.xlu0 %1146 }
0x2aa1   :  { %1149 = vst.msk [vmem:[#allocation3 + $0x4] sm:$0x3] %vm267_vm4, %v1147_v10 }
0x2aa4   :  { %v1303_v41 = vpop.permute.xlu0 %1302 }
0x2aa5   :  { %1305 = vst.msk [vmem:[#allocation3 + $0x8] sm:$0x3] %vm267_vm4, %v1303_v41 }
0x2aa8   :  { %v2008_v21 = vpop.eup %2007  ;;  %v1459_v54 = vpop.permute.xlu0 %1458 }
0x2aa9   :  { %1461 = vst.msk [vmem:[#allocation3 + $0xc] sm:$0x3] %vm267_vm4, %v1459_v54  ;;  %1531 = vrot.lane.b32.xlu1 %v2008_v21, %s2189_s12 }
0x2aac   :  { %v832_v62 = vpop.permute.xlu0 %831 }
0x2aad   :  { %834 = vst.msk [vmem:[#allocation16] sm:$0x3] %vm267_vm4, %v832_v62  ;;  %1068 = vrot.lane.b32.xlu1 %v2474_v33, %s2181_s14 }
0x2ab1   :  { %1224 = vrot.lane.b32.xlu1 %v2504_v45, %s2181_s14 }
0x2ab5   :  { %1380 = vrot.lane.b32.xlu1 %v2532_v24, %s2181_s14 }
0x2b1b   :  { %v1532_v11 = vpop.permute.xlu1 %1531 }
0x2b1c   :  { %v1534_v7 = vmul.f32 %v2006_v15, %v1532_v11 }
0x2b1e   :  { %1536 = vrot.lane.b32.xlu1 %v1534_v7, %s2181_s14 }
0x2b1f   :  { %v1069_v12 = vpop.permute.xlu1 %1068 }
0x2b20   :  { %1071 = vst.msk [vmem:[#allocation3 + $0x2] sm:$0x3] %vm267_vm4, %v1069_v12 }
0x2b22   :  { %1543 = vrot.lane.b32.xlu1 %v1528_v3, %s2190_s6 }
0x2b23   :  { %v1225_v6 = vpop.permute.xlu1 %1224 }
0x2b24   :  { %1227 = vst.msk [vmem:[#allocation3 + $0x6] sm:$0x3] %vm267_vm4, %v1225_v6 }
0x2b27   :  { %v1381_v13 = vpop.permute.xlu1 %1380 }
0x2b28   :  { %1383 = vst.msk [vmem:[#allocation3 + $0xa] sm:$0x3] %vm267_vm4, %v1381_v13 }
0x2b2b   :  { %v1548_v33 = vld [vmem:[#allocation3] sm:$0xff] }
0x2b2c   :  { %v1656_v45 = vpack.c.bf16 %v1548_v33, %v1548_v33 }
0x2b2e   :  { %1559 = vst.msk [vmem:[#allocation13] sm:$0xf] %vm1558_vm5, %v1656_v45 }
0x2b90   :  { %v1537_v14 = vpop.permute.xlu1 %1536 }
0x2b91   :  { %1539 = vst.msk [vmem:[#allocation3 + $0xe] sm:$0x3] %vm267_vm4, %v1537_v14  ;;  %1541 = vst.msk [vmem:[#allocation14 + $0x2] sm:$0x3] %vm267_vm4, %v1537_v14 }
0x2b92   :  { %2120 = shalt.err (!%p2117_p1)
}
0x2b93   :  { %s2193_s21 = smov 2   ;;  %s2194_s24 = smov [#allocation13]  }
0x2b94   :  { %1584 = dma.vmem_to_hbm [thread:$0]  %s1579_s17, 64, %s2598_s8, [#allocation15], %s2189_s12, %s2189_s12, %s2193_s21   ;;  %v1544_v4 = vpop.permute.xlu1 %1543 }
0x2b95   :  { %1547 = vst.msk [vmem:[#allocation16 + $0x2] sm:$0x3] %vm267_vm4, %v1544_v4  ;;  %s1566_s1 = sshll.u32 %s2194_s24, 4  ;;  %s2129_s25 = scalar_lea.vmem %s1591_s19, 64  ;;  %s1567_s1 = int_to_ptr.vmem [resolvable:$true] %s1566_s1 }
0x2b96   :  { %p2130_p2 = scmp.ne.s32.totalorder %s1591_s19, %s2129_s25  ;;  %p2134_p3 = scmp.lt.s32.totalorder %s1591_s19, %s1591_s19 }
0x2b97   :  { %p2135_p4 = scmp.lt.s32.totalorder %s2129_s25, %s2129_s25 }
0x2b99   :  { %p2136_p5 = por %p2135_p4, %p2134_p3 }
0x2b9b   :  { %p2137_p6 = pnand %p2136_p5, %p2130_p2 }
0x2b9d   :  { %2140 = shalt.err (!%p2137_p6)
}
0x2b9e   :  { %1596 = dma.vmem_to_hbm [thread:$0]  %s1591_s19, 64, %s2599_s9, [#allocation15], %s2189_s12, %s2189_s12, %s2193_s21   ;;  %v1549_v16 = vld [vmem:[#allocation3 + $0x8] sm:$0xff] }
0x2b9f   :  { %v1657_v17 = vpack.c.bf16 %v1549_v16, %v1549_v16  ;;  %s2149_s8 = scalar_lea.vmem %s1567_s1, 128  ;;  %p2154_p8 = scmp.lt.s32.totalorder %s1567_s1, %s1567_s1 }
0x2ba0   :  { %p2150_p7 = scmp.ne.s32.totalorder %s1567_s1, %s2149_s8  ;;  %p2155_p9 = scmp.lt.s32.totalorder %s2149_s8, %s2149_s8 }
0x2ba1   :  { %1560 = vst.msk [vmem:[#allocation13 + $0x4] sm:$0xf] %vm1558_vm5, %v1657_v17 }
0x2ba2   :  { %p2156_p10 = por %p2155_p9, %p2154_p8 }
0x2ba4   :  { %p2157_p11 = pnand %p2156_p10, %p2150_p7 }
0x2ba6   :  { %2160 = shalt.err (!%p2157_p11)
}
0x2ba7   :  { %1572 = dma.vmem_to_hbm [thread:$0]  %s1567_s1, 128, %s2597_s7, [#allocation6], %s2181_s14, %s2181_s14, %s2182_s15  }
0x2ba8   :  { %2175 = dma.done.wait [#allocation6], 128  }
0x2ba9   :  { %2176 = vsyncadd [#allocation6], 4294967168 }
0x2baa   :  { %2177 = dma.done.wait [#allocation15], 128  }
0x2bab   :  { %2178 = vsyncadd [#allocation15], 4294967168 }
0x2bac   :  { %1606 = vsyncpa [#allocation5], 1 }
0x2bad   :  { %1607 = vsyncpa [#allocation8], 1 }
0x2bae   :  { %1608 = vsyncpa [#allocation11], 1 }
0x2baf   :  { %1609 = vsyncpa [#allocation6], 1 }
0x2bb0   :  { %1610 = vsyncpa [#allocation15], 1 }

</bundles_post_ra>
